<compile_context>
chip_gen: v7x
topology: tpu7x:2x2x1
jax: 0.10.0
libtpu: 0.0.40
codegen_flags: <defaults>
</compile_context>

<pallas_src>
import jax
import jax.numpy as jnp
from jax.experimental import pallas as pl
from jax.experimental.pallas import tpu as pltpu

H1, H2 = 512, 256


def _round_up(x, m):
    return (x + m - 1) // m * m


# ----------------------------------------------------------------------------
# Kernel body
# ----------------------------------------------------------------------------
def _discriminator_kernel(x_ref, w1_ref, b1_ref, w2_ref, b2_ref, w3_ref, b3_ref,
                          o_ref):
    # x_ref: (TILE_B, D), f32 or bf16 -> bf16 for the MXU (f32 accumulation).
    x = x_ref[...].astype(jnp.bfloat16)

    # Layer 1: Linear(D, 512) + ReLU   (MXU, bf16 in / f32 acc)
    h1 = jnp.dot(x, w1_ref[...], preferred_element_type=jnp.float32)
    h1 = jnp.maximum(h1 + b1_ref[...], 0.0)

    # Layer 2: Linear(512, 256) + ReLU (MXU, bf16 in / f32 acc)
    h2 = jnp.dot(h1.astype(jnp.bfloat16), w2_ref[...],
                 preferred_element_type=jnp.float32)
    h2 = jnp.maximum(h2 + b2_ref[...], 0.0)

    # Layer 3: Linear(256, 1) + Sigmoid.  N=1 would waste 127/128 MXU lanes, so
    # do it on the VPU/XLU: elementwise multiply by the (1, 256) weight row and
    # a lane reduction.  Scalar bias comes from SMEM.
    logits = jnp.sum(h2 * w3_ref[...], axis=-1, keepdims=True) + b3_ref[0]
    o_ref[...] = jax.nn.sigmoid(logits).astype(o_ref.dtype)


# ----------------------------------------------------------------------------
# BlockSpec helpers (single-buffer resident operands when the API allows it)
# ----------------------------------------------------------------------------
def _supports_buffered():
    try:
        pl.BlockSpec((8, 128), lambda i: (0, 0), pipeline_mode=pl.Buffered(1))
        return True
    except (TypeError, AttributeError):
        return False


_HAS_BUFFERED = _supports_buffered()
_W_BUFFERS = 1 if _HAS_BUFFERED else 2


def _resident_spec(shape):
    """Constant-index operand: stays in VMEM across all grid steps."""
    idx = lambda i: tuple(0 for _ in shape)
    if _HAS_BUFFERED:
        return pl.BlockSpec(shape, idx, pipeline_mode=pl.Buffered(1))
    return pl.BlockSpec(shape, idx)


def _x_spec(tile_b, d, x_buffers):
    idx = lambda i: (i, 0)
    if x_buffers != 2 and _HAS_BUFFERED:
        return pl.BlockSpec((tile_b, d), idx, pipeline_mode=pl.Buffered(x_buffers))
    return pl.BlockSpec((tile_b, d), idx)


def _vmem_limit_bytes(tile_b, d, x_itemsize, x_buffers):
    """Honest VMEM accounting + fixed compiler-scratch margin (no 2x fudge)."""
    n = 0
    n += x_buffers * tile_b * d * x_itemsize        # pipelined x tiles
    n += _W_BUFFERS * d * H1 * 2                    # W1 (bf16, resident)
    n += _W_BUFFERS * H1 * H2 * 2                   # W2 (bf16, resident)
    n += _W_BUFFERS * (H1 + H2 + H2) * 4            # b1, b2, w3 row (f32)
    n += 2 * tile_b * 4                             # output tile (double-buffered)
    n += tile_b * (d * 2 + (H1 + H2) * 4)           # live bf16 x cast + f32 h1/h2
    return int(n + (4 << 20))                       # few-MiB margin


# ----------------------------------------------------------------------------
# Parameter preparation (hoisted out of the per-call path)
# ----------------------------------------------------------------------------
def prepare_params(params):
    """One-time conversion to kernel-ready layout: bf16 MXU weights, f32
    biases shaped (1, H), layer-3 weight as a (1, 256) f32 row, scalar b3."""
    w1, b1, w2, b2, w3, b3 = params
    return (
        jnp.asarray(w1).astype(jnp.bfloat16),
        jnp.asarray(b1, jnp.float32).reshape(1, H1),
        jnp.asarray(w2).astype(jnp.bfloat16),
        jnp.asarray(b2, jnp.float32).reshape(1, H2),
        jnp.asarray(w3, jnp.float32).reshape(1, H2),
        jnp.asarray(b3, jnp.float32).reshape(1),
    )


# ----------------------------------------------------------------------------
# Forward
# ----------------------------------------------------------------------------
def discriminator_forward(img, params, *, tile_b=512, x_buffers=2):
    """img: (B, C, H, W) float32 (or bfloat16).  Returns (B, 1) float32."""
    if params[0].dtype != jnp.bfloat16:
        # Fallback for raw f32 params; callers should call prepare_params()
        # once and reuse it (the per-call W1/W2 re-cast is an extra HBM pass).
        params = prepare_params(params)
    w1b, b1, w2b, b2, w3_row, b3_s = params

    B = img.shape[0]
    x = img.reshape(B, -1)                  # NCHW flatten == torch .view(B, -1)
    D = x.shape[1]
    assert w1b.shape == (D, H1), (w1b.shape, D)

    # Pad the batch only to a sublane multiple (8) -- never to tile_b (that
    # would cost a full extra HBM pass over x).  Partial last blocks along the
    # grid are handled by Pallas's masked boundary stores.
    Bp = _round_up(B, 8)
    if Bp != B:
        x = jnp.pad(x, ((0, Bp - B), (0, 0)))

    # Batch tile: large enough to amortize the ~0.35 us grid-step overhead,
    # but capped so the grid has >= 2 steps (v7x has 2 TCs; harmless on
    # single-TC v5e/v6e).  Always a multiple of 8 sublanes.
    tile_b = max(8, min(tile_b, _round_up(pl.cdiv(Bp, 2), 8)))
    grid = (pl.cdiv(Bp, tile_b),)

    out = pl.pallas_call(
        _discriminator_kernel,
        out_shape=jax.ShapeDtypeStruct((Bp, 1), jnp.float32),
        grid=grid,
        in_specs=[
            _x_spec(tile_b, D, x_buffers),     # x: streamed per grid step
            _resident_spec((D, H1)),           # W1 (bf16, resident)
            _resident_spec((1, H1)),           # b1
            _resident_spec((H1, H2)),          # W2 (bf16, resident)
            _resident_spec((1, H2)),           # b2
            _resident_spec((1, H2)),           # w3 row (VPU path)
            pl.BlockSpec(memory_space=pltpu.MemorySpace.SMEM),  # b3 scalar
        ],
        out_specs=pl.BlockSpec((tile_b, 1), lambda i: (i, 0)),
        compiler_params=pltpu.CompilerParams(
            dimension_semantics=("parallel",),
            vmem_limit_bytes=_vmem_limit_bytes(
                tile_b, D, jnp.dtype(x.dtype).itemsize, x_buffers),
        ),
    )(x, w1b, b1, w2b, b2, w3_row, b3_s)

    return out[:B] if Bp != B else out


# ----------------------------------------------------------------------------
# Synthetic params / reference
# ----------------------------------------------------------------------------
def init_params(key, in_dim):
    """Deterministic synthetic parameters matching the nn.Linear shapes.

    Stored pre-transposed as (in, out) so the kernel computes x @ W directly
    (PyTorch stores (out, in) and computes x @ W.T -- same math)."""
    ks = jax.random.split(key, 6)

    def lin(kw, kb, fan_in, fan_out):
        bound = 1.0 / jnp.sqrt(fan_in)
        w = jax.random.uniform(kw, (fan_in, fan_out), jnp.float32, -bound, bound)
        b = jax.random.uniform(kb, (1, fan_out), jnp.float32, -bound, bound)
        return w, b

    w1, b1 = lin(ks[0], ks[1], in_dim, H1)
    w2, b2 = lin(ks[2], ks[3], H1, H2)
    w3, b3 = lin(ks[4], ks[5], H2, 1)
    return (w1, b1, w2, b2, w3, b3)


def _reference_forward(img, params):
    w1, b1, w2, b2, w3, b3 = params
    x = img.reshape(img.shape[0], -1)
    h1 = jnp.maximum(x @ w1 + b1, 0.0)
    h2 = jnp.maximum(h1 @ w2 + b2, 0.0)
    return jax.nn.sigmoid(h2 @ w3 + b3)


if __name__ == "__main__":
    # Small shapes consistent with the module: channels=4, img_size=16 -> D=1024
    B, C, H, W = 2, 4, 16, 16
    key = jax.random.PRNGKey(0)
    k_img, k_par = jax.random.split(key)

    img = jax.random.normal(k_img, (B, C, H, W), jnp.float32)
    params = init_params(k_par, C * H * W)
    prepared = prepare_params(params)        # hoisted: cast/reshape weights once

    out = discriminator_forward(img, prepared)
    out = jax.block_until_ready(out)

    ref = _reference_forward(img, params)    # f32 reference
    assert out.shape == (B, 1), out.shape
    # bf16 MXU inputs with f32 accumulation -> relaxed tolerance vs f32 reference.
    assert jnp.allclose(out, ref, atol=2e-2, rtol=2e-2), "mismatch vs JAX reference"

    print("KERNEL_OK")
</pallas_src>

<mosaic_0001>
module attributes {stable_mosaic.version = 11 : i64} {
  func.func @_discriminator_kernel(%arg0: i32, %arg1: memref<8x1024xf32, #tpu.memory_space<vmem>>, %arg2: memref<1024x512xbf16, #tpu.memory_space<vmem>>, %arg3: memref<1x512xf32, #tpu.memory_space<vmem>>, %arg4: memref<512x256xbf16, #tpu.memory_space<vmem>>, %arg5: memref<1x256xf32, #tpu.memory_space<vmem>>, %arg6: memref<1x256xf32, #tpu.memory_space<vmem>>, %arg7: memref<1xf32, #tpu.memory_space<smem>>, %arg8: memref<8x1xf32, #tpu.memory_space<vmem>>) attributes {dimension_semantics = [#tpu.dimension_semantics<parallel>], iteration_bounds = array<i64: 1>, scalar_prefetch = 0 : i64, scratch_operands = 0 : i64, tpu.core_type = #tpu.core_type<tc>, window_params = [{transform_indices = @transform_0, window_bounds = array<i64: 8, 1024>}, {pipeline_mode = #tpu.pipeline_mode<synchronous>, transform_indices = @transform_1, window_bounds = array<i64: 1024, 512>}, {pipeline_mode = #tpu.pipeline_mode<synchronous>, transform_indices = @transform_2, window_bounds = array<i64: 1, 512>}, {pipeline_mode = #tpu.pipeline_mode<synchronous>, transform_indices = @transform_3, window_bounds = array<i64: 512, 256>}, {pipeline_mode = #tpu.pipeline_mode<synchronous>, transform_indices = @transform_4, window_bounds = array<i64: 1, 256>}, {pipeline_mode = #tpu.pipeline_mode<synchronous>, transform_indices = @transform_5, window_bounds = array<i64: 1, 256>}, {transform_indices = @transform_6, window_bounds = array<i64: 1>}, {transform_indices = @transform_7, window_bounds = array<i64: 8, 1>}]} {
    %c0 = arith.constant 0 : index
    %c0_0 = arith.constant 0 : index
    %0 = vector.load %arg1[%c0, %c0_0] : memref<8x1024xf32, #tpu.memory_space<vmem>>, vector<8x1024xf32>
    %1 = arith.truncf %0 : vector<8x1024xf32> to vector<8x1024xbf16>
    %c0_1 = arith.constant 0 : index
    %c0_2 = arith.constant 0 : index
    %2 = vector.load %arg2[%c0_1, %c0_2] : memref<1024x512xbf16, #tpu.memory_space<vmem>>, vector<1024x512xbf16>
    %cst = arith.constant dense<0.000000e+00> : vector<8x512xf32>
    %3 = tpu.matmul %1, %2, %cst {dimension_numbers = #tpu.dot_dimension_numbers<[1], [0], [0], [1], [0, 0, 1, 1], [], []>} : vector<8x1024xbf16>, vector<1024x512xbf16>, vector<8x512xf32> -> vector<8x512xf32>
    %c0_3 = arith.constant 0 : index
    %c0_4 = arith.constant 0 : index
    %4 = vector.load %arg3[%c0_3, %c0_4] : memref<1x512xf32, #tpu.memory_space<vmem>>, vector<1x512xf32>
    %5 = vector.broadcast %4 : vector<1x512xf32> to vector<8x512xf32>
    %6 = arith.addf %3, %5 : vector<8x512xf32>
    %cst_5 = arith.constant 0.000000e+00 : f32
    %7 = vector.broadcast %cst_5 : f32 to vector<8x512xf32>
    %8 = arith.maximumf %6, %7 : vector<8x512xf32>
    %9 = arith.truncf %8 : vector<8x512xf32> to vector<8x512xbf16>
    %c0_6 = arith.constant 0 : index
    %c0_7 = arith.constant 0 : index
    %10 = vector.load %arg4[%c0_6, %c0_7] : memref<512x256xbf16, #tpu.memory_space<vmem>>, vector<512x256xbf16>
    %cst_8 = arith.constant dense<0.000000e+00> : vector<8x256xf32>
    %11 = tpu.matmul %9, %10, %cst_8 {dimension_numbers = #tpu.dot_dimension_numbers<[1], [0], [0], [1], [0, 0, 1, 1], [], []>} : vector<8x512xbf16>, vector<512x256xbf16>, vector<8x256xf32> -> vector<8x256xf32>
    %c0_9 = arith.constant 0 : index
    %c0_10 = arith.constant 0 : index
    %12 = vector.load %arg5[%c0_9, %c0_10] : memref<1x256xf32, #tpu.memory_space<vmem>>, vector<1x256xf32>
    %13 = vector.broadcast %12 : vector<1x256xf32> to vector<8x256xf32>
    %14 = arith.addf %11, %13 : vector<8x256xf32>
    %cst_11 = arith.constant 0.000000e+00 : f32
    %15 = vector.broadcast %cst_11 : f32 to vector<8x256xf32>
    %16 = arith.maximumf %14, %15 : vector<8x256xf32>
    %c0_12 = arith.constant 0 : index
    %c0_13 = arith.constant 0 : index
    %17 = vector.load %arg6[%c0_12, %c0_13] : memref<1x256xf32, #tpu.memory_space<vmem>>, vector<1x256xf32>
    %18 = vector.broadcast %17 : vector<1x256xf32> to vector<8x256xf32>
    %19 = arith.mulf %16, %18 : vector<8x256xf32>
    %cst_14 = arith.constant dense<0.000000e+00> : vector<8xf32>
    %20 = vector.multi_reduction <add>, %19, %cst_14 [1] : vector<8x256xf32> to vector<8xf32>
    %21 = vector.shape_cast %20 : vector<8xf32> to vector<8x1xf32>
    %c0_15 = arith.constant 0 : index
    %22 = memref.load %arg7[%c0_15] : memref<1xf32, #tpu.memory_space<smem>>
    %23 = vector.broadcast %22 : f32 to vector<8x1xf32>
    %24 = arith.addf %21, %23 : vector<8x1xf32>
    %25 = arith.negf %24 : vector<8x1xf32>
    %26 = math.exp %25 : vector<8x1xf32>
    %cst_16 = arith.constant 1.000000e+00 : f32
    %27 = vector.broadcast %cst_16 : f32 to vector<8x1xf32>
    %28 = arith.addf %27, %26 : vector<8x1xf32>
    %29 = arith.divf %27, %28 : vector<8x1xf32>
    %c0_17 = arith.constant 0 : index
    %c0_18 = arith.constant 0 : index
    %30 = vector.load %arg8[%c0_17, %c0_18] : memref<8x1xf32, #tpu.memory_space<vmem>>, vector<8x1xf32>
    tpu.vector_store %arg8[%c0_17, %c0_18], %29 {strides = array<i32>} : memref<8x1xf32, #tpu.memory_space<vmem>>, vector<8x1xf32>,
    return
  }
  func.func @transform_0(%arg0: i32) -> (i32, i32) {
    %c0_i32 = arith.constant 0 : i32
    %c0_i32_0 = arith.constant 0 : i32
    return %arg0, %c0_i32 : i32, i32
  }
  func.func @transform_1(%arg0: i32) -> (i32, i32) {
    %c0_i32 = arith.constant 0 : i32
    %c0_i32_0 = arith.constant 0 : i32
    %c0_i32_1 = arith.constant 0 : i32
    return %c0_i32, %c0_i32_0 : i32, i32
  }
  func.func @transform_2(%arg0: i32) -> (i32, i32) {
    %c0_i32 = arith.constant 0 : i32
    %c0_i32_0 = arith.constant 0 : i32
    %c0_i32_1 = arith.constant 0 : i32
    return %c0_i32, %c0_i32_0 : i32, i32
  }
  func.func @transform_3(%arg0: i32) -> (i32, i32) {
    %c0_i32 = arith.constant 0 : i32
    %c0_i32_0 = arith.constant 0 : i32
    %c0_i32_1 = arith.constant 0 : i32
    return %c0_i32, %c0_i32_0 : i32, i32
  }
  func.func @transform_4(%arg0: i32) -> (i32, i32) {
    %c0_i32 = arith.constant 0 : i32
    %c0_i32_0 = arith.constant 0 : i32
    %c0_i32_1 = arith.constant 0 : i32
    return %c0_i32, %c0_i32_0 : i32, i32
  }
  func.func @transform_5(%arg0: i32) -> (i32, i32) {
    %c0_i32 = arith.constant 0 : i32
    %c0_i32_0 = arith.constant 0 : i32
    %c0_i32_1 = arith.constant 0 : i32
    return %c0_i32, %c0_i32_0 : i32, i32
  }
  func.func @transform_6(%arg0: i32) -> i32 {
    %c0_i32 = arith.constant 0 : i32
    %c0_i32_0 = arith.constant 0 : i32
    return %c0_i32 : i32
  }
  func.func @transform_7(%arg0: i32) -> (i32, i32) {
    %c0_i32 = arith.constant 0 : i32
    %c0_i32_0 = arith.constant 0 : i32
    return %arg0, %c0_i32 : i32, i32
  }
}

</mosaic_0001>

<bundles_post_ra>
// kernel: tpu_custom_call.1
= control target key start
LH: loop header
LB: loop body
LE: loop exit
PB: predicated region body
PF: predicated region fallthrough
CT: control target
= control target key end

     0   :  { %13 = vsyncpa [#allocation4], 0  ;;  %s3556_s0 = inlined_call_operand.hbm [shape: f32[8,1024], index: 0, kind: input, shape index: {}]   ;;  %s3557_s1 = inlined_call_operand.hbm [shape: bf16[1024,512], index: 1, kind: input, shape index: {}]   ;;  %s3558_s2 = inlined_call_operand.vmem [shape: f32[1,512], index: 2, kind: input, shape index: {}]   ;;  %s3559_s3 = inlined_call_operand.hbm [shape: bf16[512,256], index: 3, kind: input, shape index: {}]   ;;  %s3560_s4 = inlined_call_operand.vmem [shape: f32[1,256], index: 4, kind: input, shape index: {}]   ;;  %s3561_s5 = inlined_call_operand.vmem [shape: f32[1,256], index: 5, kind: input, shape index: {}]   ;;  %s3562_s6 = inlined_call_operand.<no memory space> [shape: f32[1], index: 6, kind: input, shape index: {}]   ;;  %s3563_s7 = inlined_call_operand.vmem [shape: f32[8,1], index: 7, kind: output, shape index: {}]  }
   0x1   :  { %14 = vsyncpa [#allocation6], 0  ;;  %s3404_s24 = smov [#allocation5]   ;;  %s3334_s28 = scalar_lea.hbm %s3557_s1, 32768 }
   0x2   :  { %s30_s25 = sshll.u32 %s3404_s24, 4  ;;  %p3335_p0 = scmp.ne.s32.totalorder %s3557_s1, %s3334_s28  ;;  %s31_s25 = int_to_ptr.vmem [resolvable:$true] %s30_s25 }
   0x3   :  { %p3338_p1 = scmp.lt.u32.totalorder %s3334_s28, %s3557_s1 }
   0x5   :  { %p3340_p2 = pnand %p3338_p1, %p3335_p0 }
   0x7   :  { %3343 = shalt.err (!%p3340_p2)
}
   0x8   :  { %s3344_s10 = scalar_lea.vmem %s31_s25, 32768  ;;  %p3349_p4 = scmp.lt.s32.totalorder %s31_s25, %s31_s25 }
   0x9   :  { %p3345_p3 = scmp.ne.s32.totalorder %s31_s25, %s3344_s10  ;;  %p3350_p5 = scmp.lt.s32.totalorder %s3344_s10, %s3344_s10 }
   0xb   :  { %p3351_p6 = por %p3350_p5, %p3349_p4 }
   0xd   :  { %p3352_p7 = pnand %p3351_p6, %p3345_p3 }
   0xf   :  { %3355 = shalt.err (!%p3352_p7)
}
  0x10   :  { %s3405_s11 = smov 256   ;;  %s3406_s12 = smov 16  }
  0x11   :  { %36 = dma.hbm_to_vmem [thread:$0]  %s3557_s1, 32768, %s31_s25, [#allocation6], %s3405_s11, %s3405_s11, %s3406_s12  }
  0x12   :  { %s3407_s15 = smov [#allocation3]   ;;  %s3408_s17 = smov [#allocation7]  }
  0x13   :  { %s21_s16 = sshll.u32 %s3407_s15, 4  ;;  %s44_s18 = sshll.u32 %s3408_s17, 4  ;;  %s22_s16 = int_to_ptr.vmem [resolvable:$true] %s21_s16  ;;  %s45_s18 = int_to_ptr.vmem [resolvable:$true] %s44_s18 }
  0x14   :  { %s3356_s21 = scalar_lea.hbm %s3556_s0, 1024 }
  0x15   :  { %p3357_p8 = scmp.ne.s32.totalorder %s3556_s0, %s3356_s21  ;;  %p3360_p9 = scmp.lt.u32.totalorder %s3356_s21, %s3556_s0 }
  0x17   :  { %p3362_p10 = pnand %p3360_p9, %p3357_p8 }
  0x19   :  { %3365 = shalt.err (!%p3362_p10)
}
  0x1a   :  { %s3366_s1 = scalar_lea.vmem %s22_s16, 1024  ;;  %p3371_p12 = scmp.lt.s32.totalorder %s22_s16, %s22_s16 }
  0x1b   :  { %p3367_p11 = scmp.ne.s32.totalorder %s22_s16, %s3366_s1  ;;  %p3372_p13 = scmp.lt.s32.totalorder %s3366_s1, %s3366_s1 }
  0x1d   :  { %p3373_p0 = por %p3372_p13, %p3371_p12 }
  0x1f   :  { %p3374_p1 = pnand %p3373_p0, %p3367_p11 }
  0x21   :  { %3377 = shalt.err (!%p3374_p1)
}
  0x22   :  { %24 = dma.hbm_to_vmem [thread:$0]  %s3556_s0, 1024, %s22_s16, [#allocation4]  }
  0x23   :  { %s3378_s30 = scalar_lea.hbm %s3559_s3, 8192 }
  0x24   :  { %p3379_p2 = scmp.ne.s32.totalorder %s3559_s3, %s3378_s30  ;;  %p3382_p3 = scmp.lt.u32.totalorder %s3378_s30, %s3559_s3 }
  0x26   :  { %p3384_p4 = pnand %p3382_p3, %p3379_p2 }
  0x28   :  { %3387 = shalt.err (!%p3384_p4)
}
  0x29   :  { %s3388_s12 = scalar_lea.vmem %s45_s18, 8192  ;;  %p3393_p6 = scmp.lt.s32.totalorder %s45_s18, %s45_s18 }
  0x2a   :  { %p3389_p5 = scmp.ne.s32.totalorder %s45_s18, %s3388_s12  ;;  %p3394_p7 = scmp.lt.s32.totalorder %s3388_s12, %s3388_s12 }
  0x2c   :  { %p3395_p8 = por %p3394_p7, %p3393_p6 }
  0x2e   :  { %p3396_p9 = pnand %p3395_p8, %p3389_p5 }
  0x30   :  { %3399 = shalt.err (!%p3396_p9)
}
  0x31   :  { %s3409_s0 = smov 128   ;;  %s3410_s13 = smov 8  }
  0x32   :  { %50 = dma.hbm_to_vmem [thread:$0]  %s3559_s3, 8192, %s45_s18, [#allocation6], %s3409_s0, %s3409_s0, %s3410_s13  }
  0x33   :  { %3400 = dma.done.wait [#allocation4], 1024  }
  0x34   :  { %3401 = vsyncadd [#allocation4], 4294966272 }
  0x35   :  { %3402 = dma.done.wait [#allocation6], 40960  }
  0x36   :  { %3403 = vsyncadd [#allocation6], 4294926336  ;;  %v2850_v0 = vld [vmem:[#allocation5 + $0x4] ss:$16 sps:$4 sm:$0xff]   ;;  %v2854_v2 = vld [vmem:[#allocation5] ss:$16 sps:$4 sm:$0xff]  }
  0x37   :  { %v2852_v1 = vld [vmem:[#allocation5 + $0x204] ss:$16 sps:$4 sm:$0xff]   ;;  %1640 = vmatprep.subr.bf16.mxu1 %v2850_v0  ;;  %v2855_v3 = vld [vmem:[#allocation5 + $0x200] ss:$16 sps:$4 sm:$0xff]   ;;  %v67_v46 = vld [vmem:[#allocation3 + $0x8] sm:$0xff]  ;;  %vm2482_vm0 = vcmask 7168  }
  0x38   :  { %1681 = vmatprep.subr.bf16.mxu0 %v2852_v1  ;;  %v2856_v4 = vld [vmem:[#allocation5 + $0x24] ss:$16 sps:$4 sm:$0xff]   ;;  %1641 = vmatpush1.bf16.msra.mxu1 %v2854_v2  ;;  %v2860_v6 = vld [vmem:[#allocation5 + $0x20] ss:$16 sps:$4 sm:$0xff]   ;;  %v3487_v48 = vpack.c.bf16 %v67_v46, %v67_v46  ;;  %v69_v49 = vld [vmem:[#allocation3 + $0x18] sm:$0xff] }
  0x39   :  { %1682 = vmatpush1.bf16.msra.mxu0 %v2855_v3  ;;  %v2858_v5 = vld [vmem:[#allocation5 + $0x224] ss:$16 sps:$4 sm:$0xff]   ;;  %1642 = vmatprep.subr.bf16.mxu1 %v2856_v4  ;;  %v2861_v7 = vld [vmem:[#allocation5 + $0x220] ss:$16 sps:$4 sm:$0xff]   ;;  %v3489_v52 = vpack.c.bf16 %v69_v49, %v69_v49  ;;  %v3003_v49 = vld [vmem:[#allocation5 + $0x128] ss:$16 sps:$4 sm:$0xff]  }
  0x3a   :  { %1683 = vmatprep.subr.bf16.mxu0 %v2858_v5  ;;  %v2862_v8 = vld [vmem:[#allocation5 + $0x44] ss:$16 sps:$4 sm:$0xff]   ;;  %v2866_v10 = vld [vmem:[#allocation5 + $0x40] ss:$16 sps:$4 sm:$0xff]   ;;  %1672 = vmatprep.mubr.bf16.mxu1 %v3487_v48 }
  0x3b   :  { %v2864_v9 = vld [vmem:[#allocation5 + $0x244] ss:$16 sps:$4 sm:$0xff]   ;;  %v2867_v11 = vld [vmem:[#allocation5 + $0x240] ss:$16 sps:$4 sm:$0xff]   ;;  %1713 = vmatprep.mubr.bf16.mxu0 %v3489_v52 }
  0x3c   :  { %1643 = vmatpush1.bf16.msra.mxu1 %v2860_v6  ;;  %v2868_v12 = vld [vmem:[#allocation5 + $0x64] ss:$16 sps:$4 sm:$0xff]   ;;  %v2872_v14 = vld [vmem:[#allocation5 + $0x60] ss:$16 sps:$4 sm:$0xff]  }
  0x3d   :  { %1684 = vmatpush1.bf16.msra.mxu0 %v2861_v7  ;;  %1644 = vmatprep.subr.bf16.mxu1 %v2862_v8  ;;  %v2870_v13 = vld [vmem:[#allocation5 + $0x264] ss:$16 sps:$4 sm:$0xff]   ;;  %v2873_v15 = vld [vmem:[#allocation5 + $0x260] ss:$16 sps:$4 sm:$0xff]   ;;  %v2951_v7 = vld [vmem:[#allocation5 + $0xc] ss:$16 sps:$4 sm:$0xff]  }
  0x3e   :  { %1685 = vmatprep.subr.bf16.mxu0 %v2864_v9  ;;  %v2874_v16 = vld [vmem:[#allocation5 + $0x84] ss:$16 sps:$4 sm:$0xff]   ;;  %v2878_v18 = vld [vmem:[#allocation5 + $0x80] ss:$16 sps:$4 sm:$0xff]  }
  0x3f   :  { %v2876_v17 = vld [vmem:[#allocation5 + $0x284] ss:$16 sps:$4 sm:$0xff]   ;;  %v2879_v19 = vld [vmem:[#allocation5 + $0x280] ss:$16 sps:$4 sm:$0xff]  }
  0x40   :  { %1645 = vmatpush1.bf16.msra.mxu1 %v2866_v10  ;;  %v2880_v20 = vld [vmem:[#allocation5 + $0xa4] ss:$16 sps:$4 sm:$0xff]   ;;  %v2884_v22 = vld [vmem:[#allocation5 + $0xa0] ss:$16 sps:$4 sm:$0xff]   ;;  %v2949_v10 = vld [vmem:[#allocation5 + $0x8] ss:$16 sps:$4 sm:$0xff]  }
  0x41   :  { %1686 = vmatpush1.bf16.msra.mxu0 %v2867_v11  ;;  %1646 = vmatprep.subr.bf16.mxu1 %v2868_v12  ;;  %v2882_v21 = vld [vmem:[#allocation5 + $0x2a4] ss:$16 sps:$4 sm:$0xff]   ;;  %v2885_v23 = vld [vmem:[#allocation5 + $0x2a0] ss:$16 sps:$4 sm:$0xff]  }
  0x42   :  { %1687 = vmatprep.subr.bf16.mxu0 %v2870_v13  ;;  %v2886_v24 = vld [vmem:[#allocation5 + $0xc4] ss:$16 sps:$4 sm:$0xff]   ;;  %v2890_v26 = vld [vmem:[#allocation5 + $0xc0] ss:$16 sps:$4 sm:$0xff]   ;;  %v2957_v13 = vld [vmem:[#allocation5 + $0x2c] ss:$16 sps:$4 sm:$0xff]  }
  0x43   :  { %v2888_v25 = vld [vmem:[#allocation5 + $0x2c4] ss:$16 sps:$4 sm:$0xff]   ;;  %v2891_v27 = vld [vmem:[#allocation5 + $0x2c0] ss:$16 sps:$4 sm:$0xff]  }
  0x44   :  { %1647 = vmatpush1.bf16.msra.mxu1 %v2872_v14  ;;  %v2892_v28 = vld [vmem:[#allocation5 + $0xe4] ss:$16 sps:$4 sm:$0xff]   ;;  %v2896_v30 = vld [vmem:[#allocation5 + $0xe0] ss:$16 sps:$4 sm:$0xff]  }
  0x45   :  { %1688 = vmatpush1.bf16.msra.mxu0 %v2873_v15  ;;  %1648 = vmatprep.subr.bf16.mxu1 %v2874_v16  ;;  %v2894_v29 = vld [vmem:[#allocation5 + $0x2e4] ss:$16 sps:$4 sm:$0xff]   ;;  %v2897_v31 = vld [vmem:[#allocation5 + $0x2e0] ss:$16 sps:$4 sm:$0xff]   ;;  %v2955_v15 = vld [vmem:[#allocation5 + $0x28] ss:$16 sps:$4 sm:$0xff]  }
  0x46   :  { %1689 = vmatprep.subr.bf16.mxu0 %v2876_v17  ;;  %v2898_v32 = vld [vmem:[#allocation5 + $0x104] ss:$16 sps:$4 sm:$0xff]   ;;  %v2902_v34 = vld [vmem:[#allocation5 + $0x100] ss:$16 sps:$4 sm:$0xff]   ;;  %v2963_v17 = vld [vmem:[#allocation5 + $0x4c] ss:$16 sps:$4 sm:$0xff]  }
  0x47   :  { %v2900_v33 = vld [vmem:[#allocation5 + $0x304] ss:$16 sps:$4 sm:$0xff]   ;;  %v2903_v35 = vld [vmem:[#allocation5 + $0x300] ss:$16 sps:$4 sm:$0xff]  }
  0x48   :  { %1649 = vmatpush1.bf16.msra.mxu1 %v2878_v18  ;;  %v2904_v36 = vld [vmem:[#allocation5 + $0x124] ss:$16 sps:$4 sm:$0xff]   ;;  %v2908_v38 = vld [vmem:[#allocation5 + $0x120] ss:$16 sps:$4 sm:$0xff]  }
  0x49   :  { %1690 = vmatpush1.bf16.msra.mxu0 %v2879_v19  ;;  %1650 = vmatprep.subr.bf16.mxu1 %v2880_v20  ;;  %v2906_v37 = vld [vmem:[#allocation5 + $0x324] ss:$16 sps:$4 sm:$0xff]   ;;  %v2909_v39 = vld [vmem:[#allocation5 + $0x320] ss:$16 sps:$4 sm:$0xff]   ;;  %v2961_v19 = vld [vmem:[#allocation5 + $0x48] ss:$16 sps:$4 sm:$0xff]  }
  0x4a   :  { %1691 = vmatprep.subr.bf16.mxu0 %v2882_v21  ;;  %v2910_v40 = vld [vmem:[#allocation5 + $0x144] ss:$16 sps:$4 sm:$0xff]   ;;  %v2914_v42 = vld [vmem:[#allocation5 + $0x140] ss:$16 sps:$4 sm:$0xff]   ;;  %v2969_v21 = vld [vmem:[#allocation5 + $0x6c] ss:$16 sps:$4 sm:$0xff]  }
  0x4b   :  { %v2912_v41 = vld [vmem:[#allocation5 + $0x344] ss:$16 sps:$4 sm:$0xff]   ;;  %v2915_v43 = vld [vmem:[#allocation5 + $0x340] ss:$16 sps:$4 sm:$0xff]  }
  0x4c   :  { %1651 = vmatpush1.bf16.msra.mxu1 %v2884_v22  ;;  %v2916_v44 = vld [vmem:[#allocation5 + $0x164] ss:$16 sps:$4 sm:$0xff]   ;;  %v2920_v47 = vld [vmem:[#allocation5 + $0x160] ss:$16 sps:$4 sm:$0xff]  }
  0x4d   :  { %1692 = vmatpush1.bf16.msra.mxu0 %v2885_v23  ;;  %1652 = vmatprep.subr.bf16.mxu1 %v2886_v24  ;;  %v2918_v45 = vld [vmem:[#allocation5 + $0x364] ss:$16 sps:$4 sm:$0xff]   ;;  %v2921_v50 = vld [vmem:[#allocation5 + $0x360] ss:$16 sps:$4 sm:$0xff]   ;;  %v2967_v23 = vld [vmem:[#allocation5 + $0x68] ss:$16 sps:$4 sm:$0xff]  }
  0x4e   :  { %1693 = vmatprep.subr.bf16.mxu0 %v2888_v25  ;;  %v2922_v51 = vld [vmem:[#allocation5 + $0x184] ss:$16 sps:$4 sm:$0xff]   ;;  %v2926_v54 = vld [vmem:[#allocation5 + $0x180] ss:$16 sps:$4 sm:$0xff]   ;;  %v2975_v25 = vld [vmem:[#allocation5 + $0x8c] ss:$16 sps:$4 sm:$0xff]  }
  0x4f   :  { %v2924_v53 = vld [vmem:[#allocation5 + $0x384] ss:$16 sps:$4 sm:$0xff]   ;;  %v2927_v55 = vld [vmem:[#allocation5 + $0x380] ss:$16 sps:$4 sm:$0xff]  }
  0x50   :  { %1653 = vmatpush1.bf16.msra.mxu1 %v2890_v26  ;;  %v2928_v56 = vld [vmem:[#allocation5 + $0x1a4] ss:$16 sps:$4 sm:$0xff]   ;;  %v2932_v58 = vld [vmem:[#allocation5 + $0x1a0] ss:$16 sps:$4 sm:$0xff]  }
  0x51   :  { %1694 = vmatpush1.bf16.msra.mxu0 %v2891_v27  ;;  %1654 = vmatprep.subr.bf16.mxu1 %v2892_v28  ;;  %v2930_v57 = vld [vmem:[#allocation5 + $0x3a4] ss:$16 sps:$4 sm:$0xff]   ;;  %v2933_v59 = vld [vmem:[#allocation5 + $0x3a0] ss:$16 sps:$4 sm:$0xff]   ;;  %v2973_v27 = vld [vmem:[#allocation5 + $0x88] ss:$16 sps:$4 sm:$0xff]  }
  0x52   :  { %1695 = vmatprep.subr.bf16.mxu0 %v2894_v29  ;;  %v2934_v60 = vld [vmem:[#allocation5 + $0x1c4] ss:$16 sps:$4 sm:$0xff]   ;;  %v2938_v62 = vld [vmem:[#allocation5 + $0x1c0] ss:$16 sps:$4 sm:$0xff]   ;;  %v2981_v29 = vld [vmem:[#allocation5 + $0xac] ss:$16 sps:$4 sm:$0xff]  }
  0x53   :  { %v2936_v61 = vld [vmem:[#allocation5 + $0x3c4] ss:$16 sps:$4 sm:$0xff]   ;;  %v2939_v63 = vld [vmem:[#allocation5 + $0x3c0] ss:$16 sps:$4 sm:$0xff]  }
  0x54   :  { %1655 = vmatpush1.bf16.msra.mxu1 %v2896_v30  ;;  %v2940_v0 = vld [vmem:[#allocation5 + $0x1e4] ss:$16 sps:$4 sm:$0xff]   ;;  %v2944_v2 = vld [vmem:[#allocation5 + $0x1e0] ss:$16 sps:$4 sm:$0xff]  }
  0x55   :  { %1696 = vmatpush1.bf16.msra.mxu0 %v2897_v31  ;;  %1656 = vmatprep.subr.bf16.mxu1 %v2898_v32  ;;  %v2942_v1 = vld [vmem:[#allocation5 + $0x3e4] ss:$16 sps:$4 sm:$0xff]   ;;  %v2945_v3 = vld [vmem:[#allocation5 + $0x3e0] ss:$16 sps:$4 sm:$0xff]   ;;  %v2979_v31 = vld [vmem:[#allocation5 + $0xa8] ss:$16 sps:$4 sm:$0xff]  }
  0x56   :  { %1697 = vmatprep.subr.bf16.mxu0 %v2900_v33  ;;  %v66_v4 = vld [vmem:[#allocation3] sm:$0xff]  ;;  %v68_v6 = vld [vmem:[#allocation3 + $0x10] sm:$0xff]  ;;  %v2987_v33 = vld [vmem:[#allocation5 + $0xcc] ss:$16 sps:$4 sm:$0xff]  }
  0x57   :  { %v2948_v5 = vld [vmem:[#allocation5 + $0x404] ss:$16 sps:$4 sm:$0xff]   ;;  %v3493_v8 = vpack.c.bf16 %v66_v4, %v66_v4  ;;  %v2946_v9 = vld [vmem:[#allocation5 + $0x400] ss:$16 sps:$4 sm:$0xff]   ;;  %v3495_v11 = vpack.c.bf16 %v68_v6, %v68_v6  ;;  %v3035_v4 = vld [vmem:[#allocation5 + $0x1cc] ss:$16 sps:$4 sm:$0xff]  }
  0x58   :  { %1657 = vmatpush1.bf16.msra.mxu1 %v2902_v34  ;;  %v2954_v12 = vld [vmem:[#allocation5 + $0x424] ss:$16 sps:$4 sm:$0xff]   ;;  %v2952_v14 = vld [vmem:[#allocation5 + $0x420] ss:$16 sps:$4 sm:$0xff]   ;;  %v71_v34 = vld [vmem:[#allocation3 + $0x28] sm:$0xff] }
  0x59   :  { %1698 = vmatpush1.bf16.msra.mxu0 %v2903_v35  ;;  %1658 = vmatprep.subr.bf16.mxu1 %v2904_v36  ;;  %v2960_v16 = vld [vmem:[#allocation5 + $0x444] ss:$16 sps:$4 sm:$0xff]   ;;  %v2958_v18 = vld [vmem:[#allocation5 + $0x440] ss:$16 sps:$4 sm:$0xff]   ;;  %v3500_v36 = vpack.c.bf16 %v71_v34, %v71_v34  ;;  %v3033_v6 = vld [vmem:[#allocation5 + $0x1c8] ss:$16 sps:$4 sm:$0xff]  }
  0x5a   :  { %1699 = vmatprep.subr.bf16.mxu0 %v2906_v37  ;;  %v2966_v20 = vld [vmem:[#allocation5 + $0x464] ss:$16 sps:$4 sm:$0xff]   ;;  %v2964_v22 = vld [vmem:[#allocation5 + $0x460] ss:$16 sps:$4 sm:$0xff]   ;;  %v2985_v37 = vld [vmem:[#allocation5 + $0xc8] ss:$16 sps:$4 sm:$0xff]  }
  0x5b   :  { %v2972_v24 = vld [vmem:[#allocation5 + $0x484] ss:$16 sps:$4 sm:$0xff]   ;;  %v2970_v26 = vld [vmem:[#allocation5 + $0x480] ss:$16 sps:$4 sm:$0xff]  }
  0x5c   :  { %1659 = vmatpush1.bf16.msra.mxu1 %v2908_v38  ;;  %v2978_v28 = vld [vmem:[#allocation5 + $0x4a4] ss:$16 sps:$4 sm:$0xff]   ;;  %v2976_v30 = vld [vmem:[#allocation5 + $0x4a0] ss:$16 sps:$4 sm:$0xff]  }
  0x5d   :  { %1700 = vmatpush1.bf16.msra.mxu0 %v2909_v39  ;;  %1660 = vmatprep.subr.bf16.mxu1 %v2910_v40  ;;  %v2984_v32 = vld [vmem:[#allocation5 + $0x4c4] ss:$16 sps:$4 sm:$0xff]   ;;  %v2982_v35 = vld [vmem:[#allocation5 + $0x4c0] ss:$16 sps:$4 sm:$0xff]   ;;  %v2993_v39 = vld [vmem:[#allocation5 + $0xec] ss:$16 sps:$4 sm:$0xff]  }
  0x5e   :  { %1701 = vmatprep.subr.bf16.mxu0 %v2912_v41  ;;  %v2990_v38 = vld [vmem:[#allocation5 + $0x4e4] ss:$16 sps:$4 sm:$0xff]   ;;  %v2988_v40 = vld [vmem:[#allocation5 + $0x4e0] ss:$16 sps:$4 sm:$0xff]   ;;  %v2991_v41 = vld [vmem:[#allocation5 + $0xe8] ss:$16 sps:$4 sm:$0xff]  }
  0x5f   :  { %v3002_v46 = vld [vmem:[#allocation5 + $0x524] ss:$16 sps:$4 sm:$0xff]   ;;  %v3066_v34 = vld [vmem:[#allocation5 + $0x680] ss:$16 sps:$4 sm:$0xff]  }
  0x60   :  { %1661 = vmatpush1.bf16.msra.mxu1 %v2914_v42  ;;  %v2996_v42 = vld [vmem:[#allocation5 + $0x504] ss:$16 sps:$4 sm:$0xff]  }
  0x61   :  { %1702 = vmatpush1.bf16.msra.mxu0 %v2915_v43  ;;  %1662 = vmatprep.subr.bf16.mxu1 %v2916_v44  ;;  %v2999_v43 = vld [vmem:[#allocation5 + $0x10c] ss:$16 sps:$4 sm:$0xff]   ;;  %v2994_v44 = vld [vmem:[#allocation5 + $0x500] ss:$16 sps:$4 sm:$0xff]  }
  0x62   :  { %1703 = vmatprep.subr.bf16.mxu0 %v2918_v45  ;;  %v2997_v45 = vld [vmem:[#allocation5 + $0x108] ss:$16 sps:$4 sm:$0xff]  }
  0x64   :  { %1663 = vmatpush1.bf16.msra.mxu1 %v2920_v47  ;;  %v3005_v47 = vld [vmem:[#allocation5 + $0x12c] ss:$16 sps:$4 sm:$0xff]  }
  0x65   :  { %1704 = vmatpush1.bf16.msra.mxu0 %v2921_v50  ;;  %1664 = vmatprep.subr.bf16.mxu1 %v2922_v51  ;;  %v3008_v50 = vld [vmem:[#allocation5 + $0x544] ss:$16 sps:$4 sm:$0xff]   ;;  %v3011_v51 = vld [vmem:[#allocation5 + $0x14c] ss:$16 sps:$4 sm:$0xff]  }
  0x66   :  { %1705 = vmatprep.subr.bf16.mxu0 %v2924_v53  ;;  %v3006_v53 = vld [vmem:[#allocation5 + $0x540] ss:$16 sps:$4 sm:$0xff]  }
  0x68   :  { %1665 = vmatpush1.bf16.msra.mxu1 %v2926_v54  ;;  %v3009_v54 = vld [vmem:[#allocation5 + $0x148] ss:$16 sps:$4 sm:$0xff]  }
  0x69   :  { %1706 = vmatpush1.bf16.msra.mxu0 %v2927_v55  ;;  %1666 = vmatprep.subr.bf16.mxu1 %v2928_v56  ;;  %v3014_v55 = vld [vmem:[#allocation5 + $0x564] ss:$16 sps:$4 sm:$0xff]   ;;  %v3017_v56 = vld [vmem:[#allocation5 + $0x16c] ss:$16 sps:$4 sm:$0xff]  }
  0x6a   :  { %1707 = vmatprep.subr.bf16.mxu0 %v2930_v57  ;;  %v3012_v57 = vld [vmem:[#allocation5 + $0x560] ss:$16 sps:$4 sm:$0xff]  }
  0x6c   :  { %1667 = vmatpush1.bf16.msra.mxu1 %v2932_v58  ;;  %v3015_v58 = vld [vmem:[#allocation5 + $0x168] ss:$16 sps:$4 sm:$0xff]  }
  0x6d   :  { %1708 = vmatpush1.bf16.msra.mxu0 %v2933_v59  ;;  %1668 = vmatprep.subr.bf16.mxu1 %v2934_v60  ;;  %v3020_v59 = vld [vmem:[#allocation5 + $0x584] ss:$16 sps:$4 sm:$0xff]   ;;  %v3023_v60 = vld [vmem:[#allocation5 + $0x18c] ss:$16 sps:$4 sm:$0xff]  }
  0x6e   :  { %1709 = vmatprep.subr.bf16.mxu0 %v2936_v61  ;;  %v3018_v61 = vld [vmem:[#allocation5 + $0x580] ss:$16 sps:$4 sm:$0xff]  }
  0x70   :  { %1669 = vmatpush1.bf16.msra.mxu1 %v2938_v62  ;;  %v3021_v62 = vld [vmem:[#allocation5 + $0x188] ss:$16 sps:$4 sm:$0xff]  }
  0x71   :  { %1710 = vmatpush1.bf16.msra.mxu0 %v2939_v63  ;;  %1670 = vmatprep.subr.bf16.mxu1 %v2940_v0  ;;  %v3026_v63 = vld [vmem:[#allocation5 + $0x5a4] ss:$16 sps:$4 sm:$0xff]   ;;  %v3029_v0 = vld [vmem:[#allocation5 + $0x1ac] ss:$16 sps:$4 sm:$0xff]  }
  0x72   :  { %1711 = vmatprep.subr.bf16.mxu0 %v2942_v1  ;;  %v3024_v1 = vld [vmem:[#allocation5 + $0x5a0] ss:$16 sps:$4 sm:$0xff]  }
  0x74   :  { %1671 = vmatpush1.bf16.msra.mxu1 %v2944_v2  ;;  %v3027_v2 = vld [vmem:[#allocation5 + $0x1a8] ss:$16 sps:$4 sm:$0xff]  }
  0x75   :  { %1712 = vmatpush1.bf16.msra.mxu0 %v2945_v3  ;;  %1804 = vmatprep.subr.bf16.mxu1 %v2951_v7  ;;  %v3032_v3 = vld [vmem:[#allocation5 + $0x5c4] ss:$16 sps:$4 sm:$0xff]  }
  0x76   :  { %1722 = vmatprep.subr.bf16.mxu0 %v2948_v5  ;;  %v3030_v5 = vld [vmem:[#allocation5 + $0x5c0] ss:$16 sps:$4 sm:$0xff]   ;;  %v3038_v7 = vld [vmem:[#allocation5 + $0x5e4] ss:$16 sps:$4 sm:$0xff]  }
  0x77   :  { %1673 = vmatmul.mubr.bf16.vlgmr.msra.gmra.mrb[0].mxu1 %v3493_v8 }
  0x78   :  { %1714 = vmatmul.mubr.bf16.vlgmr.msra.gmra.mrb[0].mxu0 %v3495_v11  ;;  %1805 = vmatpush1.bf16.msra.mxu1 %v2949_v10  ;;  %v3036_v10 = vld [vmem:[#allocation5 + $0x5e0] ss:$16 sps:$4 sm:$0xff]  }
  0x79   :  { %1723 = vmatpush1.bf16.msra.mxu0 %v2946_v9  ;;  %1806 = vmatprep.subr.bf16.mxu1 %v2957_v13  ;;  %v3041_v9 = vld [vmem:[#allocation5 + $0x1ec] ss:$16 sps:$4 sm:$0xff]   ;;  %v70_v13 = vld [vmem:[#allocation3 + $0x20] sm:$0xff] }
  0x7a   :  { %1724 = vmatprep.subr.bf16.mxu0 %v2954_v12  ;;  %1836 = vmatprep.mubr.bf16.mxu1 %v3487_v48  ;;  %v3000_v48 = vld [vmem:[#allocation5 + $0x520] ss:$16 sps:$4 sm:$0xff]   ;;  %v3039_v12 = vld [vmem:[#allocation5 + $0x1e8] ss:$16 sps:$4 sm:$0xff]  }
  0x7b   :  { %1754 = vmatprep.mubr.bf16.mxu0 %v3500_v36 }
  0x7c   :  { %1807 = vmatpush1.bf16.msra.mxu1 %v2955_v15  ;;  %v3047_v15 = vld [vmem:[#allocation5 + $0x20c] ss:$16 sps:$4 sm:$0xff]  }
  0x7d   :  { %1725 = vmatpush1.bf16.msra.mxu0 %v2952_v14  ;;  %1808 = vmatprep.subr.bf16.mxu1 %v2963_v17  ;;  %v3044_v14 = vld [vmem:[#allocation5 + $0x604] ss:$16 sps:$4 sm:$0xff]   ;;  %v3042_v17 = vld [vmem:[#allocation5 + $0x600] ss:$16 sps:$4 sm:$0xff]  }
  0x7e   :  { %1726 = vmatprep.subr.bf16.mxu0 %v2960_v16  ;;  %v3503_v16 = vpack.c.bf16 %v70_v13, %v70_v13  ;;  %v3126_v13 = vld [vmem:[#allocation5 + $0x7c0] ss:$16 sps:$4 sm:$0xff]  }
  0x80   :  { %1809 = vmatpush1.bf16.msra.mxu1 %v2961_v19  ;;  %v3050_v19 = vld [vmem:[#allocation5 + $0x624] ss:$16 sps:$4 sm:$0xff]  }
  0x81   :  { %1727 = vmatpush1.bf16.msra.mxu0 %v2958_v18  ;;  %1810 = vmatprep.subr.bf16.mxu1 %v2969_v21  ;;  %v3045_v18 = vld [vmem:[#allocation5 + $0x208] ss:$16 sps:$4 sm:$0xff]  }
  0x82   :  { %1728 = vmatprep.subr.bf16.mxu0 %v2966_v20  ;;  %v3053_v20 = vld [vmem:[#allocation5 + $0x22c] ss:$16 sps:$4 sm:$0xff]  }
  0x83   :  { %v73_v21 = vld [vmem:[#allocation3 + $0x38] sm:$0xff] }
  0x84   :  { %1811 = vmatpush1.bf16.msra.mxu1 %v2967_v23  ;;  %v3051_v23 = vld [vmem:[#allocation5 + $0x228] ss:$16 sps:$4 sm:$0xff]  }
  0x85   :  { %1729 = vmatpush1.bf16.msra.mxu0 %v2964_v22  ;;  %1812 = vmatprep.subr.bf16.mxu1 %v2975_v25  ;;  %v3048_v22 = vld [vmem:[#allocation5 + $0x620] ss:$16 sps:$4 sm:$0xff]   ;;  %v3056_v25 = vld [vmem:[#allocation5 + $0x644] ss:$16 sps:$4 sm:$0xff]  }
  0x86   :  { %1730 = vmatprep.subr.bf16.mxu0 %v2972_v24  ;;  %v3507_v24 = vpack.c.bf16 %v73_v21, %v73_v21  ;;  %v3140_v21 = vld [vmem:[#allocation5 + $0x40c] ss:$16 sps:$4 sm:$0xff]  }
  0x88   :  { %1813 = vmatpush1.bf16.msra.mxu1 %v2973_v27  ;;  %v3054_v27 = vld [vmem:[#allocation5 + $0x640] ss:$16 sps:$4 sm:$0xff]  }
  0x89   :  { %1731 = vmatpush1.bf16.msra.mxu0 %v2970_v26  ;;  %1814 = vmatprep.subr.bf16.mxu1 %v2981_v29  ;;  %v3059_v26 = vld [vmem:[#allocation5 + $0x24c] ss:$16 sps:$4 sm:$0xff]   ;;  %v3062_v29 = vld [vmem:[#allocation5 + $0x664] ss:$16 sps:$4 sm:$0xff]  }
  0x8a   :  { %1732 = vmatprep.subr.bf16.mxu0 %v2978_v28  ;;  %v3057_v28 = vld [vmem:[#allocation5 + $0x248] ss:$16 sps:$4 sm:$0xff]  }
  0x8c   :  { %1815 = vmatpush1.bf16.msra.mxu1 %v2979_v31  ;;  %v3063_v31 = vld [vmem:[#allocation5 + $0x268] ss:$16 sps:$4 sm:$0xff]  }
  0x8d   :  { %1733 = vmatpush1.bf16.msra.mxu0 %v2976_v30  ;;  %1816 = vmatprep.subr.bf16.mxu1 %v2987_v33  ;;  %v3060_v30 = vld [vmem:[#allocation5 + $0x660] ss:$16 sps:$4 sm:$0xff]   ;;  %v3071_v33 = vld [vmem:[#allocation5 + $0x28c] ss:$16 sps:$4 sm:$0xff]  }
  0x8e   :  { %1734 = vmatprep.subr.bf16.mxu0 %v2984_v32  ;;  %v3068_v32 = vld [vmem:[#allocation5 + $0x684] ss:$16 sps:$4 sm:$0xff]  }
  0x90   :  { %1817 = vmatpush1.bf16.msra.mxu1 %v2985_v37  ;;  %v3077_v37 = vld [vmem:[#allocation5 + $0x2ac] ss:$16 sps:$4 sm:$0xff]  }
  0x91   :  { %1735 = vmatpush1.bf16.msra.mxu0 %v2982_v35  ;;  %1818 = vmatprep.subr.bf16.mxu1 %v2993_v39  ;;  %v3069_v35 = vld [vmem:[#allocation5 + $0x288] ss:$16 sps:$4 sm:$0xff]  }
  0x92   :  { %1736 = vmatprep.subr.bf16.mxu0 %v2990_v38  ;;  %v3072_v38 = vld [vmem:[#allocation5 + $0x6a0] ss:$16 sps:$4 sm:$0xff]   ;;  %v3075_v39 = vld [vmem:[#allocation5 + $0x2a8] ss:$16 sps:$4 sm:$0xff]  }
  0x94   :  { %1819 = vmatpush1.bf16.msra.mxu1 %v2991_v41  ;;  %v3083_v41 = vld [vmem:[#allocation5 + $0x2cc] ss:$16 sps:$4 sm:$0xff]  }
  0x95   :  { %1737 = vmatpush1.bf16.msra.mxu0 %v2988_v40  ;;  %1820 = vmatprep.subr.bf16.mxu1 %v2999_v43  ;;  %v3080_v40 = vld [vmem:[#allocation5 + $0x6c4] ss:$16 sps:$4 sm:$0xff]   ;;  %v3081_v43 = vld [vmem:[#allocation5 + $0x2c8] ss:$16 sps:$4 sm:$0xff]  }
  0x96   :  { %1738 = vmatprep.subr.bf16.mxu0 %v2996_v42  ;;  %v3078_v42 = vld [vmem:[#allocation5 + $0x6c0] ss:$16 sps:$4 sm:$0xff]  }
  0x98   :  { %1821 = vmatpush1.bf16.msra.mxu1 %v2997_v45  ;;  %v3089_v45 = vld [vmem:[#allocation5 + $0x2ec] ss:$16 sps:$4 sm:$0xff]  }
  0x99   :  { %1739 = vmatpush1.bf16.msra.mxu0 %v2994_v44  ;;  %1822 = vmatprep.subr.bf16.mxu1 %v3005_v47  ;;  %v3086_v44 = vld [vmem:[#allocation5 + $0x6e4] ss:$16 sps:$4 sm:$0xff]   ;;  %v3087_v47 = vld [vmem:[#allocation5 + $0x2e8] ss:$16 sps:$4 sm:$0xff]  }
  0x9a   :  { %1740 = vmatprep.subr.bf16.mxu0 %v3002_v46  ;;  %v3084_v46 = vld [vmem:[#allocation5 + $0x6e0] ss:$16 sps:$4 sm:$0xff]  }
  0x9c   :  { %1823 = vmatpush1.bf16.msra.mxu1 %v3003_v49  ;;  %v3095_v49 = vld [vmem:[#allocation5 + $0x30c] ss:$16 sps:$4 sm:$0xff]  }
  0x9d   :  { %1741 = vmatpush1.bf16.msra.mxu0 %v3000_v48  ;;  %1824 = vmatprep.subr.bf16.mxu1 %v3011_v51  ;;  %v3092_v48 = vld [vmem:[#allocation5 + $0x704] ss:$16 sps:$4 sm:$0xff]   ;;  %v3093_v51 = vld [vmem:[#allocation5 + $0x308] ss:$16 sps:$4 sm:$0xff]  }
  0x9e   :  { %1742 = vmatprep.subr.bf16.mxu0 %v3008_v50  ;;  %v3090_v50 = vld [vmem:[#allocation5 + $0x700] ss:$16 sps:$4 sm:$0xff]  }
  0xa0   :  { %1825 = vmatpush1.bf16.msra.mxu1 %v3009_v54  ;;  %v3101_v54 = vld [vmem:[#allocation5 + $0x32c] ss:$16 sps:$4 sm:$0xff]  }
  0xa1   :  { %1743 = vmatpush1.bf16.msra.mxu0 %v3006_v53  ;;  %1826 = vmatprep.subr.bf16.mxu1 %v3017_v56  ;;  %v3098_v53 = vld [vmem:[#allocation5 + $0x724] ss:$16 sps:$4 sm:$0xff]   ;;  %v3099_v56 = vld [vmem:[#allocation5 + $0x328] ss:$16 sps:$4 sm:$0xff]  }
  0xa2   :  { %1744 = vmatprep.subr.bf16.mxu0 %v3014_v55  ;;  %v3096_v55 = vld [vmem:[#allocation5 + $0x720] ss:$16 sps:$4 sm:$0xff]  }
  0xa4   :  { %1827 = vmatpush1.bf16.msra.mxu1 %v3015_v58  ;;  %v3107_v58 = vld [vmem:[#allocation5 + $0x34c] ss:$16 sps:$4 sm:$0xff]  }
  0xa5   :  { %1745 = vmatpush1.bf16.msra.mxu0 %v3012_v57  ;;  %1828 = vmatprep.subr.bf16.mxu1 %v3023_v60  ;;  %v3104_v57 = vld [vmem:[#allocation5 + $0x744] ss:$16 sps:$4 sm:$0xff]   ;;  %v3105_v60 = vld [vmem:[#allocation5 + $0x348] ss:$16 sps:$4 sm:$0xff]  }
  0xa6   :  { %1746 = vmatprep.subr.bf16.mxu0 %v3020_v59  ;;  %v3102_v59 = vld [vmem:[#allocation5 + $0x740] ss:$16 sps:$4 sm:$0xff]  }
  0xa8   :  { %1829 = vmatpush1.bf16.msra.mxu1 %v3021_v62  ;;  %v3113_v62 = vld [vmem:[#allocation5 + $0x36c] ss:$16 sps:$4 sm:$0xff]  }
  0xa9   :  { %1747 = vmatpush1.bf16.msra.mxu0 %v3018_v61  ;;  %1830 = vmatprep.subr.bf16.mxu1 %v3029_v0  ;;  %v3110_v61 = vld [vmem:[#allocation5 + $0x764] ss:$16 sps:$4 sm:$0xff]   ;;  %v3111_v0 = vld [vmem:[#allocation5 + $0x368] ss:$16 sps:$4 sm:$0xff]  }
  0xaa   :  { %1748 = vmatprep.subr.bf16.mxu0 %v3026_v63  ;;  %v3108_v63 = vld [vmem:[#allocation5 + $0x760] ss:$16 sps:$4 sm:$0xff]  }
  0xac   :  { %1831 = vmatpush1.bf16.msra.mxu1 %v3027_v2  ;;  %v3119_v2 = vld [vmem:[#allocation5 + $0x38c] ss:$16 sps:$4 sm:$0xff]  }
  0xad   :  { %1749 = vmatpush1.bf16.msra.mxu0 %v3024_v1  ;;  %1832 = vmatprep.subr.bf16.mxu1 %v3035_v4  ;;  %v3116_v1 = vld [vmem:[#allocation5 + $0x784] ss:$16 sps:$4 sm:$0xff]   ;;  %v3117_v4 = vld [vmem:[#allocation5 + $0x388] ss:$16 sps:$4 sm:$0xff]  }
  0xae   :  { %1750 = vmatprep.subr.bf16.mxu0 %v3032_v3  ;;  %v3114_v3 = vld [vmem:[#allocation5 + $0x780] ss:$16 sps:$4 sm:$0xff]  }
  0xb0   :  { %1833 = vmatpush1.bf16.msra.mxu1 %v3033_v6  ;;  %v3125_v6 = vld [vmem:[#allocation5 + $0x3ac] ss:$16 sps:$4 sm:$0xff]  }
  0xb1   :  { %1751 = vmatpush1.bf16.msra.mxu0 %v3030_v5  ;;  %1834 = vmatprep.subr.bf16.mxu1 %v3041_v9  ;;  %v3122_v5 = vld [vmem:[#allocation5 + $0x7a4] ss:$16 sps:$4 sm:$0xff]   ;;  %v3123_v9 = vld [vmem:[#allocation5 + $0x3a8] ss:$16 sps:$4 sm:$0xff]  }
  0xb2   :  { %1752 = vmatprep.subr.bf16.mxu0 %v3038_v7  ;;  %v3120_v7 = vld [vmem:[#allocation5 + $0x7a0] ss:$16 sps:$4 sm:$0xff]  }
  0xb4   :  { %1835 = vmatpush1.bf16.msra.mxu1 %v3039_v12  ;;  %v3131_v12 = vld [vmem:[#allocation5 + $0x3cc] ss:$16 sps:$4 sm:$0xff]  }
  0xb5   :  { %1753 = vmatpush1.bf16.msra.mxu0 %v3036_v10  ;;  %1845 = vmatprep.subr.bf16.mxu1 %v3047_v15  ;;  %v3128_v10 = vld [vmem:[#allocation5 + $0x7c4] ss:$16 sps:$4 sm:$0xff]  }
  0xb6   :  { %1763 = vmatprep.subr.bf16.mxu0 %v3044_v14  ;;  %v3129_v14 = vld [vmem:[#allocation5 + $0x3c8] ss:$16 sps:$4 sm:$0xff]   ;;  %v3134_v15 = vld [vmem:[#allocation5 + $0x7e4] ss:$16 sps:$4 sm:$0xff]  }
  0xb7   :  { %1837 = vmatmul.mubr.bf16.vlgmr.msra.gmra.mrb[4].mxu1 %v3493_v8  ;;  %v3065_v8 = vld [vmem:[#allocation5 + $0x26c] ss:$16 sps:$4 sm:$0xff]  }
  0xb8   :  { %1755 = vmatmul.mubr.bf16.vlgmr.msra.gmra.mrb[0].mxu0 %v3503_v16  ;;  %1846 = vmatpush1.bf16.msra.mxu1 %v3045_v18  ;;  %v3132_v18 = vld [vmem:[#allocation5 + $0x7e0] ss:$16 sps:$4 sm:$0xff]  }
  0xb9   :  { %1764 = vmatpush1.bf16.msra.mxu0 %v3042_v17  ;;  %1847 = vmatprep.subr.bf16.mxu1 %v3053_v20  ;;  %v3137_v17 = vld [vmem:[#allocation5 + $0x3ec] ss:$16 sps:$4 sm:$0xff]   ;;  %v72_v20 = vld [vmem:[#allocation3 + $0x30] sm:$0xff] }
  0xba   :  { %1765 = vmatprep.subr.bf16.mxu0 %v3050_v19  ;;  %1795 = vmatprep.mubr.bf16.mxu0 %v3507_v24  ;;  %v3135_v19 = vld [vmem:[#allocation5 + $0x3e8] ss:$16 sps:$4 sm:$0xff]  }
  0xbb   :  { %1877 = vmatprep.mubr.bf16.mxu1 %v3489_v52  ;;  %v3074_v52 = vld [vmem:[#allocation5 + $0x6a4] ss:$16 sps:$4 sm:$0xff]  }
  0xbc   :  { %1848 = vmatpush1.bf16.msra.mxu1 %v3051_v23  ;;  %v3511_v23 = vpack.c.bf16 %v72_v20, %v72_v20  ;;  %v3188_v20 = vld [vmem:[#allocation5 + $0x60c] ss:$16 sps:$4 sm:$0xff]  }
  0xbd   :  { %1766 = vmatpush1.bf16.msra.mxu0 %v3048_v22  ;;  %1849 = vmatprep.subr.bf16.mxu1 %v3059_v26  ;;  %v3138_v22 = vld [vmem:[#allocation5 + $0x408] ss:$16 sps:$4 sm:$0xff]  }
  0xbe   :  { %1767 = vmatprep.subr.bf16.mxu0 %v3056_v25  ;;  %v3143_v25 = vld [vmem:[#allocation5 + $0x42c] ss:$16 sps:$4 sm:$0xff]   ;;  %v3234_v26 = vld [vmem:[#allocation7] ss:$8 sps:$4 sm:$0xff]  }
  0xc0   :  { %1850 = vmatpush1.bf16.msra.mxu1 %v3057_v28  ;;  %v3141_v28 = vld [vmem:[#allocation5 + $0x428] ss:$16 sps:$4 sm:$0xff]  }
  0xc1   :  { %1768 = vmatpush1.bf16.msra.mxu0 %v3054_v27  ;;  %1851 = vmatprep.subr.bf16.mxu1 %v3065_v8  ;;  %v3236_v27 = vld [vmem:[#allocation7 + $0x4] ss:$8 sps:$4 sm:$0xff]  }
  0xc2   :  { %1769 = vmatprep.subr.bf16.mxu0 %v3062_v29  ;;  %v3239_v29 = vld [vmem:[#allocation7 + $0x14] ss:$8 sps:$4 sm:$0xff]  }
  0xc3   :  { %v3146_v8 = vld [vmem:[#allocation5 + $0x44c] ss:$16 sps:$4 sm:$0xff]  }
  0xc4   :  { %1852 = vmatpush1.bf16.msra.mxu1 %v3063_v31  ;;  %v3242_v31 = vld [vmem:[#allocation7 + $0x24] ss:$8 sps:$4 sm:$0xff]  }
  0xc5   :  { %1770 = vmatpush1.bf16.msra.mxu0 %v3060_v30  ;;  %1853 = vmatprep.subr.bf16.mxu1 %v3071_v33  ;;  %v3237_v30 = vld [vmem:[#allocation7 + $0x10] ss:$8 sps:$4 sm:$0xff]   ;;  %v3149_v33 = vld [vmem:[#allocation5 + $0x46c] ss:$16 sps:$4 sm:$0xff]  }
  0xc6   :  { %1771 = vmatprep.subr.bf16.mxu0 %v3068_v32  ;;  %v3144_v32 = vld [vmem:[#allocation5 + $0x448] ss:$16 sps:$4 sm:$0xff]  }
  0xc8   :  { %1854 = vmatpush1.bf16.msra.mxu1 %v3069_v35  ;;  %v3147_v35 = vld [vmem:[#allocation5 + $0x468] ss:$16 sps:$4 sm:$0xff]  }
  0xc9   :  { %1772 = vmatpush1.bf16.msra.mxu0 %v3066_v34  ;;  %1855 = vmatprep.subr.bf16.mxu1 %v3077_v37  ;;  %v3245_v34 = vld [vmem:[#allocation7 + $0x34] ss:$8 sps:$4 sm:$0xff]   ;;  %v3248_v37 = vld [vmem:[#allocation7 + $0x44] ss:$8 sps:$4 sm:$0xff]  }
  0xca   :  { %1773 = vmatprep.subr.bf16.mxu0 %v3074_v52  ;;  %v3243_v52 = vld [vmem:[#allocation7 + $0x30] ss:$8 sps:$4 sm:$0xff]  }
  0xcc   :  { %1856 = vmatpush1.bf16.msra.mxu1 %v3075_v39  ;;  %v3155_v39 = vld [vmem:[#allocation5 + $0x4ac] ss:$16 sps:$4 sm:$0xff]  }
  0xcd   :  { %1774 = vmatpush1.bf16.msra.mxu0 %v3072_v38  ;;  %1857 = vmatprep.subr.bf16.mxu1 %v3083_v41  ;;  %v3150_v38 = vld [vmem:[#allocation5 + $0x488] ss:$16 sps:$4 sm:$0xff]   ;;  %v3251_v41 = vld [vmem:[#allocation7 + $0x54] ss:$8 sps:$4 sm:$0xff]  }
  0xce   :  { %1775 = vmatprep.subr.bf16.mxu0 %v3080_v40  ;;  %v3246_v40 = vld [vmem:[#allocation7 + $0x40] ss:$8 sps:$4 sm:$0xff]  }
  0xd0   :  { %1858 = vmatpush1.bf16.msra.mxu1 %v3081_v43  ;;  %v3158_v43 = vld [vmem:[#allocation5 + $0x4cc] ss:$16 sps:$4 sm:$0xff]  }
  0xd1   :  { %1776 = vmatpush1.bf16.msra.mxu0 %v3078_v42  ;;  %1859 = vmatprep.subr.bf16.mxu1 %v3089_v45  ;;  %v3153_v42 = vld [vmem:[#allocation5 + $0x4a8] ss:$16 sps:$4 sm:$0xff]   ;;  %v3254_v45 = vld [vmem:[#allocation7 + $0x64] ss:$8 sps:$4 sm:$0xff]  }
  0xd2   :  { %1777 = vmatprep.subr.bf16.mxu0 %v3086_v44  ;;  %v3249_v44 = vld [vmem:[#allocation7 + $0x50] ss:$8 sps:$4 sm:$0xff]  }
  0xd4   :  { %1860 = vmatpush1.bf16.msra.mxu1 %v3087_v47  ;;  %v3161_v47 = vld [vmem:[#allocation5 + $0x4ec] ss:$16 sps:$4 sm:$0xff]  }
  0xd5   :  { %1778 = vmatpush1.bf16.msra.mxu0 %v3084_v46  ;;  %1861 = vmatprep.subr.bf16.mxu1 %v3095_v49  ;;  %v3156_v46 = vld [vmem:[#allocation5 + $0x4c8] ss:$16 sps:$4 sm:$0xff]   ;;  %v3257_v49 = vld [vmem:[#allocation7 + $0x74] ss:$8 sps:$4 sm:$0xff]  }
  0xd6   :  { %1779 = vmatprep.subr.bf16.mxu0 %v3092_v48  ;;  %v3252_v48 = vld [vmem:[#allocation7 + $0x60] ss:$8 sps:$4 sm:$0xff]  }
  0xd8   :  { %1862 = vmatpush1.bf16.msra.mxu1 %v3093_v51  ;;  %v3164_v51 = vld [vmem:[#allocation5 + $0x50c] ss:$16 sps:$4 sm:$0xff]  }
  0xd9   :  { %1780 = vmatpush1.bf16.msra.mxu0 %v3090_v50  ;;  %1863 = vmatprep.subr.bf16.mxu1 %v3101_v54  ;;  %v3159_v50 = vld [vmem:[#allocation5 + $0x4e8] ss:$16 sps:$4 sm:$0xff]   ;;  %v3260_v54 = vld [vmem:[#allocation7 + $0x84] ss:$8 sps:$4 sm:$0xff]  }
  0xda   :  { %1781 = vmatprep.subr.bf16.mxu0 %v3098_v53  ;;  %v3255_v53 = vld [vmem:[#allocation7 + $0x70] ss:$8 sps:$4 sm:$0xff]  }
  0xdc   :  { %1864 = vmatpush1.bf16.msra.mxu1 %v3099_v56  ;;  %v3167_v56 = vld [vmem:[#allocation5 + $0x52c] ss:$16 sps:$4 sm:$0xff]  }
  0xdd   :  { %1782 = vmatpush1.bf16.msra.mxu0 %v3096_v55  ;;  %1865 = vmatprep.subr.bf16.mxu1 %v3107_v58  ;;  %v3162_v55 = vld [vmem:[#allocation5 + $0x508] ss:$16 sps:$4 sm:$0xff]   ;;  %v3263_v58 = vld [vmem:[#allocation7 + $0x94] ss:$8 sps:$4 sm:$0xff]  }
  0xde   :  { %1783 = vmatprep.subr.bf16.mxu0 %v3104_v57  ;;  %v3258_v57 = vld [vmem:[#allocation7 + $0x80] ss:$8 sps:$4 sm:$0xff]  }
  0xe0   :  { %1866 = vmatpush1.bf16.msra.mxu1 %v3105_v60  ;;  %v3170_v60 = vld [vmem:[#allocation5 + $0x54c] ss:$16 sps:$4 sm:$0xff]  }
  0xe1   :  { %1784 = vmatpush1.bf16.msra.mxu0 %v3102_v59  ;;  %1867 = vmatprep.subr.bf16.mxu1 %v3113_v62  ;;  %v3165_v59 = vld [vmem:[#allocation5 + $0x528] ss:$16 sps:$4 sm:$0xff]   ;;  %v3266_v62 = vld [vmem:[#allocation7 + $0xa4] ss:$8 sps:$4 sm:$0xff]  }
  0xe2   :  { %1785 = vmatprep.subr.bf16.mxu0 %v3110_v61  ;;  %v3261_v61 = vld [vmem:[#allocation7 + $0x90] ss:$8 sps:$4 sm:$0xff]  }
  0xe4   :  { %1868 = vmatpush1.bf16.msra.mxu1 %v3111_v0  ;;  %v3173_v0 = vld [vmem:[#allocation5 + $0x56c] ss:$16 sps:$4 sm:$0xff]  }
  0xe5   :  { %1786 = vmatpush1.bf16.msra.mxu0 %v3108_v63  ;;  %1869 = vmatprep.subr.bf16.mxu1 %v3119_v2  ;;  %v3168_v63 = vld [vmem:[#allocation5 + $0x548] ss:$16 sps:$4 sm:$0xff]   ;;  %v3269_v2 = vld [vmem:[#allocation7 + $0xb4] ss:$8 sps:$4 sm:$0xff]  }
  0xe6   :  { %1787 = vmatprep.subr.bf16.mxu0 %v3116_v1  ;;  %v3264_v1 = vld [vmem:[#allocation7 + $0xa0] ss:$8 sps:$4 sm:$0xff]  }
  0xe8   :  { %1870 = vmatpush1.bf16.msra.mxu1 %v3117_v4  ;;  %v3176_v4 = vld [vmem:[#allocation5 + $0x58c] ss:$16 sps:$4 sm:$0xff]  }
  0xe9   :  { %1788 = vmatpush1.bf16.msra.mxu0 %v3114_v3  ;;  %1871 = vmatprep.subr.bf16.mxu1 %v3125_v6  ;;  %v3171_v3 = vld [vmem:[#allocation5 + $0x568] ss:$16 sps:$4 sm:$0xff]   ;;  %v3272_v6 = vld [vmem:[#allocation7 + $0xc4] ss:$8 sps:$4 sm:$0xff]  }
  0xea   :  { %1789 = vmatprep.subr.bf16.mxu0 %v3122_v5  ;;  %v3267_v5 = vld [vmem:[#allocation7 + $0xb0] ss:$8 sps:$4 sm:$0xff]  }
  0xec   :  { %1872 = vmatpush1.bf16.msra.mxu1 %v3123_v9  ;;  %v3179_v9 = vld [vmem:[#allocation5 + $0x5ac] ss:$16 sps:$4 sm:$0xff]  }
  0xed   :  { %1790 = vmatpush1.bf16.msra.mxu0 %v3120_v7  ;;  %1873 = vmatprep.subr.bf16.mxu1 %v3131_v12  ;;  %v3174_v7 = vld [vmem:[#allocation5 + $0x588] ss:$16 sps:$4 sm:$0xff]   ;;  %v3275_v12 = vld [vmem:[#allocation7 + $0xd4] ss:$8 sps:$4 sm:$0xff]  }
  0xee   :  { %1791 = vmatprep.subr.bf16.mxu0 %v3128_v10  ;;  %v3270_v10 = vld [vmem:[#allocation7 + $0xc0] ss:$8 sps:$4 sm:$0xff]  }
  0xf0   :  { %1874 = vmatpush1.bf16.msra.mxu1 %v3129_v14  ;;  %v3182_v14 = vld [vmem:[#allocation5 + $0x5cc] ss:$16 sps:$4 sm:$0xff]  }
  0xf1   :  { %1792 = vmatpush1.bf16.msra.mxu0 %v3126_v13  ;;  %1875 = vmatprep.subr.bf16.mxu1 %v3137_v17  ;;  %v3177_v13 = vld [vmem:[#allocation5 + $0x5a8] ss:$16 sps:$4 sm:$0xff]  }
  0xf2   :  { %1793 = vmatprep.subr.bf16.mxu0 %v3134_v15  ;;  %v3273_v15 = vld [vmem:[#allocation7 + $0xd0] ss:$8 sps:$4 sm:$0xff]  }
  0xf3   :  { %v3180_v17 = vld [vmem:[#allocation5 + $0x5c8] ss:$16 sps:$4 sm:$0xff]  }
  0xf4   :  { %1876 = vmatpush1.bf16.msra.mxu1 %v3135_v19  ;;  %v3183_v19 = vld [vmem:[#allocation5 + $0x5e8] ss:$16 sps:$4 sm:$0xff]  }
  0xf5   :  { %1794 = vmatpush1.bf16.msra.mxu0 %v3132_v18  ;;  %1886 = vmatprep.subr.bf16.mxu1 %v3140_v21  ;;  %v3185_v18 = vld [vmem:[#allocation5 + $0x5ec] ss:$16 sps:$4 sm:$0xff]   ;;  %v3186_v21 = vld [vmem:[#allocation5 + $0x608] ss:$16 sps:$4 sm:$0xff]  }
  0xf6   :  { %2372 = vmatprep.subr.bf16.mxu0 %v3236_v27  ;;  %v3192_v27 = vld [vmem:[#allocation5 + $0x648] ss:$16 sps:$4 sm:$0xff]  }
  0xf7   :  { %1878 = vmatmul.mubr.bf16.vlgmr.msra.gmra.mrb[4].mxu1 %v3495_v11  ;;  %v3240_v11 = vld [vmem:[#allocation7 + $0x20] ss:$8 sps:$4 sm:$0xff]  }
  0xf8   :  { %1796 = vmatmul.mubr.bf16.vlgmr.msra.gmra.mrb[0].mxu0 %v3511_v23  ;;  %1887 = vmatpush1.bf16.msra.mxu1 %v3138_v22  ;;  %v3191_v22 = vld [vmem:[#allocation5 + $0x62c] ss:$16 sps:$4 sm:$0xff]  }
  0xf9   :  { %1918 = vmatprep.mubr.bf16.mxu1 %v3500_v36  ;;  %1888 = vmatprep.subr.bf16.mxu1 %v3143_v25  ;;  %v3152_v36 = vld [vmem:[#allocation5 + $0x48c] ss:$16 sps:$4 sm:$0xff]   ;;  %v3189_v25 = vld [vmem:[#allocation5 + $0x628] ss:$16 sps:$4 sm:$0xff]  }
  0xfa   :  { %2373 = vmatpush1.bf16.msra.mxu0 %v3234_v26  ;;  %v3194_v26 = vld [vmem:[#allocation5 + $0x64c] ss:$16 sps:$4 sm:$0xff]  }
  0xfb   :  { %2374 = vmatprep.subr.bf16.mxu0 %v3239_v29  ;;  %v3195_v29 = vld [vmem:[#allocation5 + $0x668] ss:$16 sps:$4 sm:$0xff]  }
  0xfc   :  { %1889 = vmatpush1.bf16.msra.mxu1 %v3141_v28  ;;  %v3197_v28 = vld [vmem:[#allocation5 + $0x66c] ss:$16 sps:$4 sm:$0xff]  }
  0xfd   :  { %1890 = vmatprep.subr.bf16.mxu1 %v3146_v8  ;;  %v3200_v8 = vld [vmem:[#allocation5 + $0x68c] ss:$16 sps:$4 sm:$0xff]  }
  0xfe   :  { %2375 = vmatpush1.bf16.msra.mxu0 %v3237_v30  ;;  %v3198_v30 = vld [vmem:[#allocation5 + $0x688] ss:$16 sps:$4 sm:$0xff]  }
  0xff   :  { %2376 = vmatprep.subr.bf16.mxu0 %v3242_v31  ;;  %v3203_v31 = vld [vmem:[#allocation5 + $0x6ac] ss:$16 sps:$4 sm:$0xff]  }
 0x100   :  { %1891 = vmatpush1.bf16.msra.mxu1 %v3144_v32  ;;  %v3206_v32 = vld [vmem:[#allocation5 + $0x6cc] ss:$16 sps:$4 sm:$0xff]  }
 0x101   :  { %1892 = vmatprep.subr.bf16.mxu1 %v3149_v33  ;;  %v3278_v33 = vld [vmem:[#allocation7 + $0xe4] ss:$8 sps:$4 sm:$0xff]  }
 0x102   :  { %2377 = vmatpush1.bf16.msra.mxu0 %v3240_v11  ;;  %v3276_v11 = vld [vmem:[#allocation7 + $0xe0] ss:$8 sps:$4 sm:$0xff]  }
 0x103   :  { %2378 = vmatprep.subr.bf16.mxu0 %v3245_v34 }
 0x104   :  { %1893 = vmatpush1.bf16.msra.mxu1 %v3147_v35 }
 0x105   :  { %1894 = vmatprep.subr.bf16.mxu1 %v3152_v36  ;;  %v3204_v36 = vld [vmem:[#allocation5 + $0x6c8] ss:$16 sps:$4 sm:$0xff]  }
 0x106   :  { %2379 = vmatpush1.bf16.msra.mxu0 %v3243_v52 }
 0x107   :  { %2380 = vmatprep.subr.bf16.mxu0 %v3248_v37  ;;  %v3209_v37 = vld [vmem:[#allocation5 + $0x6ec] ss:$16 sps:$4 sm:$0xff]  }
 0x108   :  { %1895 = vmatpush1.bf16.msra.mxu1 %v3150_v38  ;;  %v3281_v38 = vld [vmem:[#allocation7 + $0xf4] ss:$8 sps:$4 sm:$0xff]  }
 0x109   :  { %1896 = vmatprep.subr.bf16.mxu1 %v3155_v39  ;;  %v3279_v39 = vld [vmem:[#allocation7 + $0xf0] ss:$8 sps:$4 sm:$0xff]  }
 0x10a   :  { %2381 = vmatpush1.bf16.msra.mxu0 %v3246_v40  ;;  %v3207_v40 = vld [vmem:[#allocation5 + $0x6e8] ss:$16 sps:$4 sm:$0xff]  }
 0x10b   :  { %2382 = vmatprep.subr.bf16.mxu0 %v3251_v41  ;;  %v3212_v41 = vld [vmem:[#allocation5 + $0x70c] ss:$16 sps:$4 sm:$0xff]  }
 0x10c   :  { %1897 = vmatpush1.bf16.msra.mxu1 %v3153_v42  ;;  %v3284_v42 = vld [vmem:[#allocation7 + $0x104] ss:$8 sps:$4 sm:$0xff]  }
 0x10d   :  { %1898 = vmatprep.subr.bf16.mxu1 %v3158_v43  ;;  %v3210_v43 = vld [vmem:[#allocation5 + $0x708] ss:$16 sps:$4 sm:$0xff]  }
 0x10e   :  { %2383 = vmatpush1.bf16.msra.mxu0 %v3249_v44  ;;  %v3215_v44 = vld [vmem:[#allocation5 + $0x72c] ss:$16 sps:$4 sm:$0xff]  }
 0x10f   :  { %2384 = vmatprep.subr.bf16.mxu0 %v3254_v45  ;;  %v3213_v45 = vld [vmem:[#allocation5 + $0x728] ss:$16 sps:$4 sm:$0xff]  }
 0x110   :  { %1899 = vmatpush1.bf16.msra.mxu1 %v3156_v46  ;;  %v3218_v46 = vld [vmem:[#allocation5 + $0x74c] ss:$16 sps:$4 sm:$0xff]  }
 0x111   :  { %1900 = vmatprep.subr.bf16.mxu1 %v3161_v47  ;;  %v3216_v47 = vld [vmem:[#allocation5 + $0x748] ss:$16 sps:$4 sm:$0xff]  }
 0x112   :  { %2385 = vmatpush1.bf16.msra.mxu0 %v3252_v48  ;;  %v3221_v48 = vld [vmem:[#allocation5 + $0x76c] ss:$16 sps:$4 sm:$0xff]  }
 0x113   :  { %2386 = vmatprep.subr.bf16.mxu0 %v3257_v49  ;;  %v3219_v49 = vld [vmem:[#allocation5 + $0x768] ss:$16 sps:$4 sm:$0xff]  }
 0x114   :  { %1901 = vmatpush1.bf16.msra.mxu1 %v3159_v50  ;;  %v3224_v50 = vld [vmem:[#allocation5 + $0x78c] ss:$16 sps:$4 sm:$0xff]  }
 0x115   :  { %1902 = vmatprep.subr.bf16.mxu1 %v3164_v51  ;;  %v3222_v51 = vld [vmem:[#allocation5 + $0x788] ss:$16 sps:$4 sm:$0xff]  }
 0x116   :  { %2387 = vmatpush1.bf16.msra.mxu0 %v3255_v53  ;;  %v3227_v53 = vld [vmem:[#allocation5 + $0x7ac] ss:$16 sps:$4 sm:$0xff]  }
 0x117   :  { %2388 = vmatprep.subr.bf16.mxu0 %v3260_v54  ;;  %v3225_v54 = vld [vmem:[#allocation5 + $0x7a8] ss:$16 sps:$4 sm:$0xff]  }
 0x118   :  { %1903 = vmatpush1.bf16.msra.mxu1 %v3162_v55  ;;  %v3230_v55 = vld [vmem:[#allocation5 + $0x7cc] ss:$16 sps:$4 sm:$0xff]  }
 0x119   :  { %1904 = vmatprep.subr.bf16.mxu1 %v3167_v56  ;;  %v3228_v56 = vld [vmem:[#allocation5 + $0x7c8] ss:$16 sps:$4 sm:$0xff]  }
 0x11a   :  { %2389 = vmatpush1.bf16.msra.mxu0 %v3258_v57  ;;  %v3233_v57 = vld [vmem:[#allocation5 + $0x7ec] ss:$16 sps:$4 sm:$0xff]  }
 0x11b   :  { %2390 = vmatprep.subr.bf16.mxu0 %v3263_v58  ;;  %v3231_v58 = vld [vmem:[#allocation5 + $0x7e8] ss:$16 sps:$4 sm:$0xff]  }
 0x11c   :  { %1905 = vmatpush1.bf16.msra.mxu1 %v3165_v59  ;;  %v340_v59 = vlaneseq }
 0x11d   :  { %1906 = vmatprep.subr.bf16.mxu1 %v3170_v60 }
 0x11e   :  { %2391 = vmatpush1.bf16.msra.mxu0 %v3261_v61  ;;  %v3519_v60 = vshrl.u32 %v340_v59, 7  ;;  %v2040_v59 = vld [vmem:[%s3560_s4] sm:$0x3] }
 0x11f   :  { %2392 = vmatprep.subr.bf16.mxu0 %v3266_v62  ;;  %v3527_v62 = vld [vmem:[%s3558_s2] sm:$0xf] }
 0x120   :  { %1907 = vmatpush1.bf16.msra.mxu1 %v3168_v63  ;;  %v3522_v61 = vsub.s32 0, %v3519_v60  ;;  %v3530_v63 = vsub.s32 1, %v3519_v60 }
 0x121   :  { %1908 = vmatprep.subr.bf16.mxu1 %v3173_v0 }
 0x122   :  { %2393 = vmatpush1.bf16.msra.mxu0 %v3264_v1  ;;  %v343_v0 = vrot.slane %v3527_v62, %v3522_v61 }
 0x123   :  { %2394 = vmatprep.subr.bf16.mxu0 %v3269_v2 }
 0x124   :  { %1909 = vmatpush1.bf16.msra.mxu1 %v3171_v3 }
 0x125   :  { %1910 = vmatprep.subr.bf16.mxu1 %v3176_v4 }
 0x126   :  { %2395 = vmatpush1.bf16.msra.mxu0 %v3267_v5 }
 0x127   :  { %2396 = vmatprep.subr.bf16.mxu0 %v3272_v6 }
 0x128   :  { %1911 = vmatpush1.bf16.msra.mxu1 %v3174_v7 }
 0x129   :  { %1912 = vmatprep.subr.bf16.mxu1 %v3179_v9 }
 0x12a   :  { %2397 = vmatpush1.bf16.msra.mxu0 %v3270_v10 }
 0x12b   :  { %2398 = vmatprep.subr.bf16.mxu0 %v3275_v12 }
 0x12c   :  { %1913 = vmatpush1.bf16.msra.mxu1 %v3177_v13 }
 0x12d   :  { %1914 = vmatprep.subr.bf16.mxu1 %v3182_v14  ;;  %v3282_v14 = vld [vmem:[#allocation7 + $0x100] ss:$8 sps:$4 sm:$0xff]  }
 0x12e   :  { %2399 = vmatpush1.bf16.msra.mxu0 %v3273_v15 }
 0x12f   :  { %2400 = vmatprep.subr.bf16.mxu0 %v3278_v33  ;;  %v3311_v33 = vld [vmem:[#allocation7 + $0x194] ss:$8 sps:$4 sm:$0xff]  }
 0x130   :  { %1915 = vmatpush1.bf16.msra.mxu1 %v3180_v17  ;;  %v3287_v17 = vld [vmem:[#allocation7 + $0x114] ss:$8 sps:$4 sm:$0xff]  }
 0x131   :  { %1916 = vmatprep.subr.bf16.mxu1 %v3185_v18  ;;  %v3285_v18 = vld [vmem:[#allocation7 + $0x110] ss:$8 sps:$4 sm:$0xff]  }
 0x132   :  { %2401 = vmatpush1.bf16.msra.mxu0 %v3276_v11  ;;  %v3314_v11 = vld [vmem:[#allocation7 + $0x1a4] ss:$8 sps:$4 sm:$0xff]  }
 0x133   :  { %2402 = vmatprep.subr.bf16.mxu0 %v3281_v38  ;;  %v3323_v38 = vld [vmem:[#allocation7 + $0x1d4] ss:$8 sps:$4 sm:$0xff]  }
 0x134   :  { %1917 = vmatpush1.bf16.msra.mxu1 %v3183_v19  ;;  %v3290_v19 = vld [vmem:[#allocation7 + $0x124] ss:$8 sps:$4 sm:$0xff]  }
 0x135   :  { %1927 = vmatprep.subr.bf16.mxu1 %v3188_v20  ;;  %v3288_v20 = vld [vmem:[#allocation7 + $0x120] ss:$8 sps:$4 sm:$0xff]  }
 0x136   :  { %2403 = vmatpush1.bf16.msra.mxu0 %v3279_v39  ;;  %v3321_v39 = vld [vmem:[#allocation7 + $0x1d0] ss:$8 sps:$4 sm:$0xff]  }
 0x137   :  { %1919 = vmatmul.mubr.bf16.vlgmr.msra.gmra.mrb[4].mxu1 %v3503_v16  ;;  %v3201_v16 = vld [vmem:[#allocation5 + $0x6a8] ss:$16 sps:$4 sm:$0xff]   ;;  %2413 = vmatprep.subr.bf16.mxu0 %v3284_v42  ;;  %v3329_v42 = vld [vmem:[#allocation7 + $0x1f4] ss:$8 sps:$4 sm:$0xff]  }
 0x138   :  { %1928 = vmatpush1.bf16.msra.mxu1 %v3186_v21  ;;  %1959 = vmatprep.mubr.bf16.mxu1 %v3507_v24  ;;  %v3293_v21 = vld [vmem:[#allocation7 + $0x134] ss:$8 sps:$4 sm:$0xff]  }
 0x139   :  { %1929 = vmatprep.subr.bf16.mxu1 %v3191_v22  ;;  %v3291_v22 = vld [vmem:[#allocation7 + $0x130] ss:$8 sps:$4 sm:$0xff]  }
 0x13c   :  { %1930 = vmatpush1.bf16.msra.mxu1 %v3189_v25  ;;  %v3296_v25 = vld [vmem:[#allocation7 + $0x144] ss:$8 sps:$4 sm:$0xff]  }
 0x13d   :  { %1931 = vmatprep.subr.bf16.mxu1 %v3194_v26  ;;  %v3294_v26 = vld [vmem:[#allocation7 + $0x140] ss:$8 sps:$4 sm:$0xff]  }
 0x140   :  { %1932 = vmatpush1.bf16.msra.mxu1 %v3192_v27  ;;  %v3299_v27 = vld [vmem:[#allocation7 + $0x154] ss:$8 sps:$4 sm:$0xff]  }
 0x141   :  { %1933 = vmatprep.subr.bf16.mxu1 %v3197_v28  ;;  %v3297_v28 = vld [vmem:[#allocation7 + $0x150] ss:$8 sps:$4 sm:$0xff]  }
 0x144   :  { %1934 = vmatpush1.bf16.msra.mxu1 %v3195_v29  ;;  %v3302_v29 = vld [vmem:[#allocation7 + $0x164] ss:$8 sps:$4 sm:$0xff]  }
 0x145   :  { %1935 = vmatprep.subr.bf16.mxu1 %v3200_v8  ;;  %v3300_v8 = vld [vmem:[#allocation7 + $0x160] ss:$8 sps:$4 sm:$0xff]  }
 0x148   :  { %1936 = vmatpush1.bf16.msra.mxu1 %v3198_v30  ;;  %v3305_v30 = vld [vmem:[#allocation7 + $0x174] ss:$8 sps:$4 sm:$0xff]  }
 0x149   :  { %1937 = vmatprep.subr.bf16.mxu1 %v3203_v31  ;;  %v3303_v31 = vld [vmem:[#allocation7 + $0x170] ss:$8 sps:$4 sm:$0xff]  }
 0x14a   :  { %v1674_v24 = vpop.f32.mrb[0].mxu1 }
 0x14b   :  { %v1676_v34 = vpop.f32.mrb[1].mxu1  ;;  %v1675_v1 = vadd.f32 %v1674_v24, %v343_v0  ;;  %v3309_v24 = vld [vmem:[#allocation7 + $0x190] ss:$8 sps:$4 sm:$0xff]   ;;  %v2456_v0 = vld [vmem:[%s3561_s5] sm:$0x3] }
 0x14c   :  { %v1678_v35 = vpop.f32.mrb[2].mxu1  ;;  %1938 = vmatpush1.bf16.msra.mxu1 %v3201_v16  ;;  %v3308_v16 = vld [vmem:[#allocation7 + $0x184] ss:$8 sps:$4 sm:$0xff]  }
 0x14d   :  { %v1679_v52 = vpop.f32.mrb[3].mxu1  ;;  %1939 = vmatprep.subr.bf16.mxu1 %v3206_v32  ;;  %v3306_v32 = vld [vmem:[#allocation7 + $0x180] ss:$8 sps:$4 sm:$0xff]   ;;  %v3317_v35 = vld [vmem:[#allocation7 + $0x1b4] ss:$8 sps:$4 sm:$0xff]  }
 0x14e   :  { %v3320_v52 = vld [vmem:[#allocation7 + $0x1c4] ss:$8 sps:$4 sm:$0xff]  }
 0x150   :  { %1940 = vmatpush1.bf16.msra.mxu1 %v3204_v36  ;;  %v3315_v36 = vld [vmem:[#allocation7 + $0x1b0] ss:$8 sps:$4 sm:$0xff]  }
 0x151   :  { %1941 = vmatprep.subr.bf16.mxu1 %v3209_v37  ;;  %v3318_v37 = vld [vmem:[#allocation7 + $0x1c0] ss:$8 sps:$4 sm:$0xff]  }
 0x154   :  { %1942 = vmatpush1.bf16.msra.mxu1 %v3207_v40  ;;  %v3326_v40 = vld [vmem:[#allocation7 + $0x1e4] ss:$8 sps:$4 sm:$0xff]  }
 0x155   :  { %1943 = vmatprep.subr.bf16.mxu1 %v3212_v41  ;;  %v3324_v41 = vld [vmem:[#allocation7 + $0x1e0] ss:$8 sps:$4 sm:$0xff]  }
 0x158   :  { %1944 = vmatpush1.bf16.msra.mxu1 %v3210_v43  ;;  %v3327_v43 = vld [vmem:[#allocation7 + $0x1f0] ss:$8 sps:$4 sm:$0xff]  }
 0x159   :  { %1945 = vmatprep.subr.bf16.mxu1 %v3215_v44  ;;  %v350_v44 = vsub.s32 2, %v3519_v60 }
 0x15c   :  { %1946 = vmatpush1.bf16.msra.mxu1 %v3213_v45  ;;  %v354_v45 = vsub.s32 3, %v3519_v60  ;;  %v2045_v60 = vrot.slane %v2040_v59, %v3522_v61 }
 0x15d   :  { %1947 = vmatprep.subr.bf16.mxu1 %v3218_v46  ;;  %v351_v46 = vrot.slane %v3527_v62, %v350_v44 }
 0x160   :  { %1948 = vmatpush1.bf16.msra.mxu1 %v3216_v47  ;;  %v355_v47 = vrot.slane %v3527_v62, %v354_v45 }
 0x161   :  { %1949 = vmatprep.subr.bf16.mxu1 %v3221_v48 }
 0x164   :  { %1950 = vmatpush1.bf16.msra.mxu1 %v3219_v49 }
 0x165   :  { %1951 = vmatprep.subr.bf16.mxu1 %v3224_v50 }
 0x168   :  { %1952 = vmatpush1.bf16.msra.mxu1 %v3222_v51 }
 0x169   :  { %1953 = vmatprep.subr.bf16.mxu1 %v3227_v53 }
 0x16c   :  { %1954 = vmatpush1.bf16.msra.mxu1 %v3225_v54 }
 0x16d   :  { %1955 = vmatprep.subr.bf16.mxu1 %v3230_v55 }
 0x170   :  { %1956 = vmatpush1.bf16.msra.mxu1 %v3228_v56 }
 0x171   :  { %1957 = vmatprep.subr.bf16.mxu1 %v3233_v57 }
 0x174   :  { %1958 = vmatpush1.bf16.msra.mxu1 %v3231_v58 }
 0x177   :  { %1960 = vmatmul.mubr.bf16.vlgmr.msra.gmra.mrb[4].mxu1 %v3511_v23  ;;  %v347_v23 = vrot.slane %v3527_v62, %v3530_v63  ;;  %v2049_v62 = vrot.slane %v2040_v59, %v3530_v63 }
 0x179   :  { %v1677_v2 = vadd.f32 %v1676_v34, %v347_v23  ;;  %v3312_v34 = vld [vmem:[#allocation7 + $0x1a0] ss:$8 sps:$4 sm:$0xff]  }
 0x1cb   :  { %v1797_v3 = vpop.f32.mrb[0].mxu0 }
 0x1cc   :  { %v2812_v4 = vadd.f32 %v1797_v3, %v1675_v1  ;;  %v1799_v5 = vpop.f32.mrb[1].mxu0  ;;  %v2461_v3 = vrot.slane %v2456_v0, %v3522_v61 }
 0x1cd   :  { %v2814_v6 = vadd.f32 %v1799_v5, %v1677_v2  ;;  %v1801_v7 = vpop.f32.mrb[2].mxu0 }
 0x1ce   :  { %v1968_v9 = vmax.f32 %v2812_v4, 0.0  ;;  %v1802_v10 = vpop.f32.mrb[3].mxu0 }
 0x1cf   :  { %v1969_v12 = vmax.f32 %v2814_v6, 0.0  ;;  %v2465_v6 = vrot.slane %v2456_v0, %v3530_v63 }
 0x1d0   :  { %v1972_v15 = vpack.c.bf16 %v1968_v9, %v1968_v9 }
 0x1d1   :  { %v1973_v13 = vpack.c.bf16 %v1969_v12, %v1969_v12 }
 0x1d3   :  { %2404 = vmatprep.mubr.bf16.mxu0 %v1973_v13 }
 0x1d4   :  { %2405 = vmatmul.mubr.bf16.vlgmr.msra.gmra.mrb[4].mxu0 %v1972_v15  ;;  %v2474_v15 = vstv %s3562_s6 }
 0x1d5   :  { %2414 = vmatpush1.bf16.msra.mxu0 %v3282_v14 }
 0x1d6   :  { %2415 = vmatprep.subr.bf16.mxu0 %v3287_v17 }
 0x1d9   :  { %2416 = vmatpush1.bf16.msra.mxu0 %v3285_v18 }
 0x1da   :  { %2417 = vmatprep.subr.bf16.mxu0 %v3290_v19 }
 0x1dd   :  { %2418 = vmatpush1.bf16.msra.mxu0 %v3288_v20 }
 0x1de   :  { %2419 = vmatprep.subr.bf16.mxu0 %v3293_v21 }
 0x1e1   :  { %2420 = vmatpush1.bf16.msra.mxu0 %v3291_v22 }
 0x1e2   :  { %2421 = vmatprep.subr.bf16.mxu0 %v3296_v25 }
 0x1e5   :  { %2422 = vmatpush1.bf16.msra.mxu0 %v3294_v26 }
 0x1e6   :  { %2423 = vmatprep.subr.bf16.mxu0 %v3299_v27 }
 0x1e9   :  { %2424 = vmatpush1.bf16.msra.mxu0 %v3297_v28 }
 0x1ea   :  { %2425 = vmatprep.subr.bf16.mxu0 %v3302_v29 }
 0x1ed   :  { %2426 = vmatpush1.bf16.msra.mxu0 %v3300_v8 }
 0x1ee   :  { %2427 = vmatprep.subr.bf16.mxu0 %v3305_v30 }
 0x1f1   :  { %2428 = vmatpush1.bf16.msra.mxu0 %v3303_v31 }
 0x1f2   :  { %2429 = vmatprep.subr.bf16.mxu0 %v3308_v16 }
 0x1f5   :  { %2430 = vmatpush1.bf16.msra.mxu0 %v3306_v32 }
 0x1f6   :  { %2431 = vmatprep.subr.bf16.mxu0 %v3311_v33 }
 0x1f9   :  { %2432 = vmatpush1.bf16.msra.mxu0 %v3309_v24 }
 0x1fa   :  { %2433 = vmatprep.subr.bf16.mxu0 %v3314_v11 }
 0x1fd   :  { %2434 = vmatpush1.bf16.msra.mxu0 %v3312_v34 }
 0x1fe   :  { %2435 = vmatprep.subr.bf16.mxu0 %v3317_v35 }
 0x201   :  { %2436 = vmatpush1.bf16.msra.mxu0 %v3315_v36 }
 0x202   :  { %2437 = vmatprep.subr.bf16.mxu0 %v3320_v52 }
 0x205   :  { %2438 = vmatpush1.bf16.msra.mxu0 %v3318_v37 }
 0x206   :  { %2439 = vmatprep.subr.bf16.mxu0 %v3323_v38 }
 0x209   :  { %2440 = vmatpush1.bf16.msra.mxu0 %v3321_v39 }
 0x20a   :  { %2441 = vmatprep.subr.bf16.mxu0 %v3326_v40 }
 0x20d   :  { %2442 = vmatpush1.bf16.msra.mxu0 %v3324_v41 }
 0x20e   :  { %2443 = vmatprep.subr.bf16.mxu0 %v3329_v42 }
 0x211   :  { %2444 = vmatpush1.bf16.msra.mxu0 %v3327_v43 }
 0x24a   :  { %v1961_v48 = vpop.f32.mrb[4].mxu1 }
 0x24b   :  { %v2815_v49 = vadd.f32 %v1961_v48, %v351_v46  ;;  %v1963_v50 = vpop.f32.mrb[5].mxu1 }
 0x24c   :  { %v2816_v51 = vadd.f32 %v1963_v50, %v355_v47  ;;  %v1965_v53 = vpop.f32.mrb[6].mxu1 }
 0x24d   :  { %v1970_v54 = vmax.f32 %v2815_v49, 0.0  ;;  %v1966_v55 = vpop.f32.mrb[7].mxu1 }
 0x24e   :  { %v1971_v56 = vmax.f32 %v2816_v51, 0.0 }
 0x24f   :  { %v1974_v58 = vpack.c.bf16 %v1970_v54, %v1970_v54 }
 0x250   :  { %v1975_v57 = vpack.c.bf16 %v1971_v56, %v1971_v56 }
 0x252   :  { %2445 = vmatprep.mubr.bf16.mxu0 %v1975_v57 }
 0x253   :  { %2446 = vmatmul.mubr.bf16.vlgmr.msra.gmra.mrb[4].mxu0 %v1974_v58 }
 0x326   :  { %v2447_v23 = vpop.f32.mrb[4].mxu0 }
 0x327   :  { %v2817_v1 = vadd.f32 %v2447_v23, %v2045_v60  ;;  %v2449_v2 = vpop.f32.mrb[5].mxu0 }
 0x328   :  { %v2818_v4 = vadd.f32 %v2449_v2, %v2049_v62  ;;  %v2451_v5 = vpop.f32.mrb[6].mxu0 }
 0x329   :  { %v2454_v7 = vmax.f32 %v2817_v1, 0.0  ;;  %v2452_v9 = vpop.f32.mrb[7].mxu0 }
 0x32a   :  { %v2455_v10 = vmax.f32 %v2818_v4, 0.0 }
 0x32b   :  { %v2468_v12 = vmul.f32 %v2461_v3, %v2454_v7 }
 0x32c   :  { %v2469_v13 = vmul.f32 %v2465_v6, %v2455_v10 }
 0x32e   :  { %v2470_v14 = vadd.f32 %v2469_v13, %v2468_v12 }
 0x330   :  { %2471 = vadd.xlane.f32.xlu0 %v2470_v14 }
 0x3bd   :  { %v2472_v17 = vpop.xlane.xlu0 %2471 }
 0x3be   :  { %v2475_v18 = vadd.f32 %v2474_v15, %v2472_v17 }
 0x3c0   :  { %v2810_v19 = vmul.f32 -1.442695, %v2475_v18 }
 0x3c2   :  { %3330 = vpow2.f32 %v2810_v19 }
 0x3cc   :  { %v3331_v61 = vpop.eup %3330 }
 0x3cd   :  { %v2479_v20 = vadd.f32 1.0, %v3331_v61 }
 0x3cf   :  { %3332 = vrcp.f32 %v2479_v20 }
 0x3d9   :  { %v3333_v63 = vpop.eup %3332 }
 0x3da   :  { %2483 = vst.msk [vmem:[%s3563_s7] sm:$0xff] %vm2482_vm0, %v3333_v63 }
 0x3db   :  { %2488 = vsyncpa [#allocation4], 1 }
 0x3dc   :  { %2489 = vsyncpa [#allocation6], 1 }

</bundles_post_ra>
